<compile_context>
chip_gen: v7x
topology: tpu7x:2x2x1
jax: 0.10.0
libtpu: 0.0.40
codegen_flags: <defaults>
</compile_context>

<pallas_src>
import jax
import jax.numpy as jnp
from jax.experimental import pallas as pl
from jax.experimental.pallas import tpu as pltpu

IN_DIM = 28 * 28     # 784
HID_DIM = 500        # d in the PyTorch module
HID_PAD = 512        # lane-dense padded hidden width (cols 500:512 are zeros)


def _round_up(x, m):
    return (x + m - 1) // m * m


def autoencoder_kernel(y_ref, w_enc_ref, b_enc_ref, w_dec_ref, b_dec_ref, out_ref):
    # Encoder: Linear(784 -> 512[=500 padded]) + Tanh.
    # bf16 weights upcast in-register; f32 activations + f32 MXU accumulation.
    h = jnp.tanh(
        jnp.dot(y_ref[...], w_enc_ref[...].astype(jnp.float32),
                preferred_element_type=jnp.float32)
        + b_enc_ref[...]
    )
    # Decoder: Linear(512 -> 784) + Tanh. Padded hidden cols are exactly 0
    # (tanh(0)=0) and multiply zero rows of w_dec, so semantics match 500-d.
    out_ref[...] = jnp.tanh(
        jnp.dot(h, w_dec_ref[...].astype(jnp.float32),
                preferred_element_type=jnp.float32)
        + b_dec_ref[...]
    ).astype(out_ref.dtype)


def autoencoder_forward(y, w_enc, b_enc, w_dec, b_dec, block_batch=256):
    """y: (batch, 784) f32. Weights are the padded bf16 params from prepare_params."""
    batch, in_dim = y.shape
    hid = w_enc.shape[1]

    # Batch tile: multiple of 8 sublanes, up to block_batch rows per tile.
    tb = min(block_batch, _round_up(batch, 8))
    padded = _round_up(batch, tb)
    if padded != batch:
        y = jnp.pad(y, ((0, padded - batch), (0, 0)))

    cost = pl.CostEstimate(
        flops=2 * padded * (in_dim * hid + hid * in_dim),
        transcendentals=padded * (hid + in_dim),
        bytes_accessed=(w_enc.size * w_enc.dtype.itemsize
                        + w_dec.size * w_dec.dtype.itemsize
                        + b_enc.size * b_enc.dtype.itemsize
                        + b_dec.size * b_dec.dtype.itemsize
                        + 2 * padded * in_dim * 4),
    )

    out = pl.pallas_call(
        autoencoder_kernel,
        out_shape=jax.ShapeDtypeStruct((padded, in_dim), jnp.float32),
        grid=(padded // tb,),
        in_specs=[
            pl.BlockSpec((tb, in_dim), lambda i: (i, 0)),      # batch-tiled input
            pl.BlockSpec((in_dim, hid), lambda i: (0, 0)),     # resident weights
            pl.BlockSpec((1, hid), lambda i: (0, 0)),          # resident bias
            pl.BlockSpec((hid, in_dim), lambda i: (0, 0)),     # resident weights
            pl.BlockSpec((1, in_dim), lambda i: (0, 0)),       # resident bias
        ],
        out_specs=pl.BlockSpec((tb, in_dim), lambda i: (i, 0)),
        compiler_params=pltpu.CompilerParams(
            dimension_semantics=("parallel",)),                # v7x: split batch across TCs
        cost_estimate=cost,
    )(y, w_enc, b_enc, w_dec, b_dec)

    return out[:batch]


def init_params(key):
    """f32 params mimicking nn.Linear default init (uniform +/- 1/sqrt(fan_in))."""
    k1, k2, k3, k4 = jax.random.split(key, 4)
    lim_enc = 1.0 / jnp.sqrt(jnp.float32(IN_DIM))
    lim_dec = 1.0 / jnp.sqrt(jnp.float32(HID_DIM))
    w_enc = jax.random.uniform(k1, (IN_DIM, HID_DIM), jnp.float32, -lim_enc, lim_enc)
    b_enc = jax.random.uniform(k2, (1, HID_DIM), jnp.float32, -lim_enc, lim_enc)
    w_dec = jax.random.uniform(k3, (HID_DIM, IN_DIM), jnp.float32, -lim_dec, lim_dec)
    b_dec = jax.random.uniform(k4, (1, IN_DIM), jnp.float32, -lim_dec, lim_dec)
    return w_enc, b_enc, w_dec, b_dec


def prepare_params(w_enc, b_enc, w_dec, b_dec):
    """One-time: pad hidden 500->512 with zeros, cast weights to bf16, keep biases f32."""
    pad_h = HID_PAD - HID_DIM
    w_enc_p = jnp.pad(w_enc, ((0, 0), (0, pad_h))).astype(jnp.bfloat16)
    b_enc_p = jnp.pad(b_enc, ((0, 0), (0, pad_h)))
    w_dec_p = jnp.pad(w_dec, ((0, pad_h), (0, 0))).astype(jnp.bfloat16)
    return w_enc_p, b_enc_p, w_dec_p, b_dec


if __name__ == "__main__":
    key = jax.random.PRNGKey(0)
    k_a, k_b, k_params = jax.random.split(key, 3)

    batch = 8
    # y = (img[A] + img[B]) / 2  — averaged pairs of flattened 28x28 "images"
    img_a = jax.random.uniform(k_a, (batch, IN_DIM), jnp.float32)
    img_b = jax.random.uniform(k_b, (batch, IN_DIM), jnp.float32)
    y = (img_a + img_b) / 2.0

    w_enc, b_enc, w_dec, b_dec = init_params(k_params)
    params = prepare_params(w_enc, b_enc, w_dec, b_dec)

    out = jax.jit(autoencoder_forward)(y, *params)
    out = jax.block_until_ready(out)

    # Pure-JAX reference with the same bf16-quantized weights, f32 math.
    we = w_enc.astype(jnp.bfloat16).astype(jnp.float32)
    wd = w_dec.astype(jnp.bfloat16).astype(jnp.float32)
    ref = jnp.tanh(jnp.tanh(y @ we + b_enc) @ wd + b_dec)

    assert out.shape == (batch, IN_DIM)
    assert jnp.allclose(out, ref, atol=1e-2, rtol=1e-2), float(jnp.max(jnp.abs(out - ref)))

    print("KERNEL_OK")
</pallas_src>

<mosaic_0001>
module attributes {stable_mosaic.version = 11 : i64} {
  func.func @autoencoder_kernel(%arg0: i32, %arg1: memref<8x784xf32, #tpu.memory_space<vmem>>, %arg2: memref<784x512xbf16, #tpu.memory_space<vmem>>, %arg3: memref<1x512xf32, #tpu.memory_space<vmem>>, %arg4: memref<512x784xbf16, #tpu.memory_space<vmem>>, %arg5: memref<1x784xf32, #tpu.memory_space<vmem>>, %arg6: memref<8x784xf32, #tpu.memory_space<vmem>>) attributes {dimension_semantics = [#tpu.dimension_semantics<parallel>], iteration_bounds = array<i64: 1>, scalar_prefetch = 0 : i64, scratch_operands = 0 : i64, tpu.core_type = #tpu.core_type<tc>, window_params = [{transform_indices = @transform_0, window_bounds = array<i64: 8, 784>}, {pipeline_mode = #tpu.pipeline_mode<synchronous>, transform_indices = @transform_1, window_bounds = array<i64: 784, 512>}, {pipeline_mode = #tpu.pipeline_mode<synchronous>, transform_indices = @transform_2, window_bounds = array<i64: 1, 512>}, {pipeline_mode = #tpu.pipeline_mode<synchronous>, transform_indices = @transform_3, window_bounds = array<i64: 512, 784>}, {pipeline_mode = #tpu.pipeline_mode<synchronous>, transform_indices = @transform_4, window_bounds = array<i64: 1, 784>}, {transform_indices = @transform_5, window_bounds = array<i64: 8, 784>}]} {
    %c0 = arith.constant 0 : index
    %c0_0 = arith.constant 0 : index
    %0 = vector.load %arg1[%c0, %c0_0] : memref<8x784xf32, #tpu.memory_space<vmem>>, vector<8x784xf32>
    %c0_1 = arith.constant 0 : index
    %c0_2 = arith.constant 0 : index
    %1 = vector.load %arg2[%c0_1, %c0_2] : memref<784x512xbf16, #tpu.memory_space<vmem>>, vector<784x512xbf16>
    %2 = arith.extf %1 : vector<784x512xbf16> to vector<784x512xf32>
    %cst = arith.constant dense<0.000000e+00> : vector<8x512xf32>
    %3 = tpu.matmul %0, %2, %cst {dimension_numbers = #tpu.dot_dimension_numbers<[1], [0], [0], [1], [0, 0, 1, 1], [], []>} : vector<8x784xf32>, vector<784x512xf32>, vector<8x512xf32> -> vector<8x512xf32>
    %c0_3 = arith.constant 0 : index
    %c0_4 = arith.constant 0 : index
    %4 = vector.load %arg3[%c0_3, %c0_4] : memref<1x512xf32, #tpu.memory_space<vmem>>, vector<1x512xf32>
    %5 = vector.broadcast %4 : vector<1x512xf32> to vector<8x512xf32>
    %6 = arith.addf %3, %5 : vector<8x512xf32>
    %7 = math.tanh %6 : vector<8x512xf32>
    %c0_5 = arith.constant 0 : index
    %c0_6 = arith.constant 0 : index
    %8 = vector.load %arg4[%c0_5, %c0_6] : memref<512x784xbf16, #tpu.memory_space<vmem>>, vector<512x784xbf16>
    %9 = arith.extf %8 : vector<512x784xbf16> to vector<512x784xf32>
    %cst_7 = arith.constant dense<0.000000e+00> : vector<8x784xf32>
    %10 = tpu.matmul %7, %9, %cst_7 {dimension_numbers = #tpu.dot_dimension_numbers<[1], [0], [0], [1], [0, 0, 1, 1], [], []>} : vector<8x512xf32>, vector<512x784xf32>, vector<8x784xf32> -> vector<8x784xf32>
    %c0_8 = arith.constant 0 : index
    %c0_9 = arith.constant 0 : index
    %11 = vector.load %arg5[%c0_8, %c0_9] : memref<1x784xf32, #tpu.memory_space<vmem>>, vector<1x784xf32>
    %12 = vector.broadcast %11 : vector<1x784xf32> to vector<8x784xf32>
    %13 = arith.addf %10, %12 : vector<8x784xf32>
    %14 = math.tanh %13 : vector<8x784xf32>
    %c0_10 = arith.constant 0 : index
    %c0_11 = arith.constant 0 : index
    %15 = vector.load %arg6[%c0_10, %c0_11] : memref<8x784xf32, #tpu.memory_space<vmem>>, vector<8x784xf32>
    tpu.vector_store %arg6[%c0_10, %c0_11], %14 {strides = array<i32>} : memref<8x784xf32, #tpu.memory_space<vmem>>, vector<8x784xf32>,
    return
  }
  func.func @transform_0(%arg0: i32) -> (i32, i32) {
    %c0_i32 = arith.constant 0 : i32
    %c0_i32_0 = arith.constant 0 : i32
    return %arg0, %c0_i32 : i32, i32
  }
  func.func @transform_1(%arg0: i32) -> (i32, i32) {
    %c0_i32 = arith.constant 0 : i32
    %c0_i32_0 = arith.constant 0 : i32
    %c0_i32_1 = arith.constant 0 : i32
    return %c0_i32, %c0_i32_0 : i32, i32
  }
  func.func @transform_2(%arg0: i32) -> (i32, i32) {
    %c0_i32 = arith.constant 0 : i32
    %c0_i32_0 = arith.constant 0 : i32
    %c0_i32_1 = arith.constant 0 : i32
    return %c0_i32, %c0_i32_0 : i32, i32
  }
  func.func @transform_3(%arg0: i32) -> (i32, i32) {
    %c0_i32 = arith.constant 0 : i32
    %c0_i32_0 = arith.constant 0 : i32
    %c0_i32_1 = arith.constant 0 : i32
    return %c0_i32, %c0_i32_0 : i32, i32
  }
  func.func @transform_4(%arg0: i32) -> (i32, i32) {
    %c0_i32 = arith.constant 0 : i32
    %c0_i32_0 = arith.constant 0 : i32
    %c0_i32_1 = arith.constant 0 : i32
    return %c0_i32, %c0_i32_0 : i32, i32
  }
  func.func @transform_5(%arg0: i32) -> (i32, i32) {
    %c0_i32 = arith.constant 0 : i32
    %c0_i32_0 = arith.constant 0 : i32
    return %arg0, %c0_i32 : i32, i32
  }
}

</mosaic_0001>

<bundles_post_ra>
// kernel: autoencoder_forward.1
= control target key start
LH: loop header
LB: loop body
LE: loop exit
PB: predicated region body
PF: predicated region fallthrough
CT: control target
= control target key end

     0   :  { %v4572_v2 = vmov 0.0   ;;  %vm638_vm0 = vcmask 130048   ;;  %s5975_s0 = inlined_call_operand.vmem [shape: f32[8,784], index: 0, kind: input, shape index: {}]   ;;  %s5976_s1 = inlined_call_operand.vmem [shape: bf16[784,512], index: 1, kind: input, shape index: {}]   ;;  %s5977_s2 = inlined_call_operand.vmem [shape: f32[1,512], index: 2, kind: input, shape index: {}]   ;;  %s5978_s3 = inlined_call_operand.vmem [shape: bf16[512,784], index: 3, kind: input, shape index: {}]   ;;  %s5979_s4 = inlined_call_operand.vmem [shape: f32[1,784], index: 4, kind: input, shape index: {}]   ;;  %s5980_s5 = inlined_call_operand.hbm [shape: f32[8,784], index: 5, kind: output, shape index: {}]  }
   0x1   :  { %v3911_v0 = vld [vmem:[%s5976_s1 + $0x4] ss:$16 sps:$4 sm:$0xff]   ;;  %919 = vmatprep.mubr.f32.mxu1 %v4572_v2  ;;  %v3915_v3 = vld [vmem:[%s5976_s1] ss:$16 sps:$4 sm:$0xff]   ;;  %v3919_v6 = vld [vmem:[%s5976_s1 + $0xc] ss:$16 sps:$4 sm:$0xff]  }
   0x2   :  { %v3913_v1 = vld [vmem:[%s5976_s1 + $0x604] ss:$16 sps:$4 sm:$0xff]   ;;  %2622 = vmatprep.subr.bf16.mxu0 %v3911_v0  ;;  %v3916_v4 = vld [vmem:[%s5976_s1 + $0x600] ss:$16 sps:$4 sm:$0xff]   ;;  %v3921_v7 = vld [vmem:[%s5976_s1 + $0x8] ss:$16 sps:$4 sm:$0xff]  }
   0x3   :  { %2814 = vmatprep.subr.bf16.mxu1 %v3913_v1  ;;  %v3917_v5 = vld [vmem:[%s5976_s1 + $0x24] ss:$16 sps:$4 sm:$0xff]   ;;  %2624 = vmatpush1.bf16.msra.mxu0 %v3915_v3  ;;  %v3922_v8 = vld [vmem:[%s5976_s1 + $0x20] ss:$16 sps:$4 sm:$0xff]   ;;  %v3925_v11 = vld [vmem:[%s5976_s1 + $0x2c] ss:$16 sps:$4 sm:$0xff]  }
   0x4   :  { %2816 = vmatpush1.bf16.msra.mxu1 %v3916_v4  ;;  %2626 = vmatprep.subr.bf16.mxu0 %v3917_v5  ;;  %v27_v9 = vld [vmem:[%s5975_s0 + $0x30] sm:$0xff]  ;;  %v3927_v12 = vld [vmem:[%s5976_s1 + $0x28] ss:$16 sps:$4 sm:$0xff]   ;;  %v3931_v15 = vld [vmem:[%s5976_s1 + $0x4c] ss:$16 sps:$4 sm:$0xff]  }
   0x5   :  { %2818 = vmatprep.subr.bf16.mxu1 %v3919_v6  ;;  %v3923_v10 = vld [vmem:[%s5976_s1 + $0x44] ss:$16 sps:$4 sm:$0xff]   ;;  %v3928_v13 = vld [vmem:[%s5976_s1 + $0x40] ss:$16 sps:$4 sm:$0xff]   ;;  %v3933_v16 = vld [vmem:[%s5976_s1 + $0x48] ss:$16 sps:$4 sm:$0xff]  }
   0x6   :  { %v3929_v14 = vld [vmem:[%s5976_s1 + $0x64] ss:$16 sps:$4 sm:$0xff]   ;;  %v3934_v17 = vld [vmem:[%s5976_s1 + $0x60] ss:$16 sps:$4 sm:$0xff]   ;;  %v3937_v19 = vld [vmem:[%s5976_s1 + $0x6c] ss:$16 sps:$4 sm:$0xff]  }
   0x7   :  { %2549 = vmatmul.mubr.msk.f32.vlgmr.msra.gmra.mrb[0].mxu1 %vm638_vm0, %v27_v9  ;;  %2628 = vmatpush1.bf16.msra.mxu0 %v3922_v8  ;;  %v3935_v18 = vld [vmem:[%s5976_s1 + $0x84] ss:$16 sps:$4 sm:$0xff]   ;;  %v3939_v20 = vld [vmem:[%s5976_s1 + $0x68] ss:$16 sps:$4 sm:$0xff]   ;;  %v3940_v21 = vld [vmem:[%s5976_s1 + $0x80] ss:$16 sps:$4 sm:$0xff]  }
   0x8   :  { %2820 = vmatpush1.bf16.msra.mxu1 %v3921_v7  ;;  %2630 = vmatprep.subr.bf16.mxu0 %v3923_v10  ;;  %v3941_v22 = vld [vmem:[%s5976_s1 + $0xa4] ss:$16 sps:$4 sm:$0xff]   ;;  %v3943_v23 = vld [vmem:[%s5976_s1 + $0x8c] ss:$16 sps:$4 sm:$0xff]   ;;  %v3945_v24 = vld [vmem:[%s5976_s1 + $0x88] ss:$16 sps:$4 sm:$0xff]  }
   0x9   :  { %2822 = vmatprep.subr.bf16.mxu1 %v3925_v11  ;;  %v3946_v25 = vld [vmem:[%s5976_s1 + $0xa0] ss:$16 sps:$4 sm:$0xff]   ;;  %v3947_v26 = vld [vmem:[%s5976_s1 + $0xc4] ss:$16 sps:$4 sm:$0xff]   ;;  %v3949_v27 = vld [vmem:[%s5976_s1 + $0xac] ss:$16 sps:$4 sm:$0xff]  }
   0xa   :  { %v3951_v28 = vld [vmem:[%s5976_s1 + $0xa8] ss:$16 sps:$4 sm:$0xff]   ;;  %v3952_v29 = vld [vmem:[%s5976_s1 + $0xc0] ss:$16 sps:$4 sm:$0xff]   ;;  %v3953_v30 = vld [vmem:[%s5976_s1 + $0xe4] ss:$16 sps:$4 sm:$0xff]  }
   0xb   :  { %2632 = vmatpush1.bf16.msra.mxu0 %v3928_v13  ;;  %v3955_v31 = vld [vmem:[%s5976_s1 + $0xcc] ss:$16 sps:$4 sm:$0xff]   ;;  %v3957_v32 = vld [vmem:[%s5976_s1 + $0xc8] ss:$16 sps:$4 sm:$0xff]   ;;  %v3958_v33 = vld [vmem:[%s5976_s1 + $0xe0] ss:$16 sps:$4 sm:$0xff]  }
   0xc   :  { %2824 = vmatpush1.bf16.msra.mxu1 %v3927_v12  ;;  %2634 = vmatprep.subr.bf16.mxu0 %v3929_v14  ;;  %v3959_v34 = vld [vmem:[%s5976_s1 + $0x104] ss:$16 sps:$4 sm:$0xff]   ;;  %v3961_v35 = vld [vmem:[%s5976_s1 + $0xec] ss:$16 sps:$4 sm:$0xff]   ;;  %v3963_v36 = vld [vmem:[%s5976_s1 + $0xe8] ss:$16 sps:$4 sm:$0xff]  }
   0xd   :  { %2826 = vmatprep.subr.bf16.mxu1 %v3931_v15  ;;  %v3964_v37 = vld [vmem:[%s5976_s1 + $0x100] ss:$16 sps:$4 sm:$0xff]   ;;  %v3965_v38 = vld [vmem:[%s5976_s1 + $0x124] ss:$16 sps:$4 sm:$0xff]   ;;  %v3967_v39 = vld [vmem:[%s5976_s1 + $0x10c] ss:$16 sps:$4 sm:$0xff]  }
   0xe   :  { %v3969_v40 = vld [vmem:[%s5976_s1 + $0x108] ss:$16 sps:$4 sm:$0xff]   ;;  %v3970_v41 = vld [vmem:[%s5976_s1 + $0x120] ss:$16 sps:$4 sm:$0xff]   ;;  %v3971_v42 = vld [vmem:[%s5976_s1 + $0x144] ss:$16 sps:$4 sm:$0xff]  }
   0xf   :  { %2636 = vmatpush1.bf16.msra.mxu0 %v3934_v17  ;;  %v3973_v43 = vld [vmem:[%s5976_s1 + $0x12c] ss:$16 sps:$4 sm:$0xff]   ;;  %v3975_v44 = vld [vmem:[%s5976_s1 + $0x128] ss:$16 sps:$4 sm:$0xff]   ;;  %v3976_v45 = vld [vmem:[%s5976_s1 + $0x140] ss:$16 sps:$4 sm:$0xff]  }
  0x10   :  { %2828 = vmatpush1.bf16.msra.mxu1 %v3933_v16  ;;  %2638 = vmatprep.subr.bf16.mxu0 %v3935_v18  ;;  %v3977_v46 = vld [vmem:[%s5976_s1 + $0x164] ss:$16 sps:$4 sm:$0xff]   ;;  %v3979_v47 = vld [vmem:[%s5976_s1 + $0x14c] ss:$16 sps:$4 sm:$0xff]   ;;  %v3981_v49 = vld [vmem:[%s5976_s1 + $0x148] ss:$16 sps:$4 sm:$0xff]  }
  0x11   :  { %2830 = vmatprep.subr.bf16.mxu1 %v3937_v19  ;;  %v22_v48 = vld [vmem:[%s5975_s0 + $0x8] sm:$0xff]  ;;  %v3982_v50 = vld [vmem:[%s5976_s1 + $0x160] ss:$16 sps:$4 sm:$0xff]   ;;  %v3983_v51 = vld [vmem:[%s5976_s1 + $0x184] ss:$16 sps:$4 sm:$0xff]  }
  0x12   :  { %v3985_v52 = vld [vmem:[%s5976_s1 + $0x16c] ss:$16 sps:$4 sm:$0xff]   ;;  %706 = vmatprep.mubr.f32.mxu0 %v22_v48  ;;  %990 = vmatprep.mubr.f32.mxu1 %v22_v48  ;;  %v3987_v53 = vld [vmem:[%s5976_s1 + $0x168] ss:$16 sps:$4 sm:$0xff]   ;;  %v3988_v54 = vld [vmem:[%s5976_s1 + $0x180] ss:$16 sps:$4 sm:$0xff]  }
  0x13   :  { %2640 = vmatpush1.bf16.msra.mxu0 %v3940_v21  ;;  %v3989_v55 = vld [vmem:[%s5976_s1 + $0x1a4] ss:$16 sps:$4 sm:$0xff]   ;;  %v3991_v56 = vld [vmem:[%s5976_s1 + $0x18c] ss:$16 sps:$4 sm:$0xff]   ;;  %v3993_v57 = vld [vmem:[%s5976_s1 + $0x188] ss:$16 sps:$4 sm:$0xff]  }
  0x14   :  { %2832 = vmatpush1.bf16.msra.mxu1 %v3939_v20  ;;  %2642 = vmatprep.subr.bf16.mxu0 %v3941_v22  ;;  %v3994_v58 = vld [vmem:[%s5976_s1 + $0x1a0] ss:$16 sps:$4 sm:$0xff]   ;;  %v3995_v59 = vld [vmem:[%s5976_s1 + $0x1c4] ss:$16 sps:$4 sm:$0xff]   ;;  %v3997_v60 = vld [vmem:[%s5976_s1 + $0x1ac] ss:$16 sps:$4 sm:$0xff]  }
  0x15   :  { %2834 = vmatprep.subr.bf16.mxu1 %v3943_v23  ;;  %v3999_v61 = vld [vmem:[%s5976_s1 + $0x1a8] ss:$16 sps:$4 sm:$0xff]   ;;  %v4000_v62 = vld [vmem:[%s5976_s1 + $0x1c0] ss:$16 sps:$4 sm:$0xff]   ;;  %v4001_v63 = vld [vmem:[%s5976_s1 + $0x1e4] ss:$16 sps:$4 sm:$0xff]  }
  0x16   :  { %v4003_v0 = vld [vmem:[%s5976_s1 + $0x1cc] ss:$16 sps:$4 sm:$0xff]   ;;  %v4005_v1 = vld [vmem:[%s5976_s1 + $0x1c8] ss:$16 sps:$4 sm:$0xff]   ;;  %v4006_v3 = vld [vmem:[%s5976_s1 + $0x1e0] ss:$16 sps:$4 sm:$0xff]  }
  0x17   :  { %2644 = vmatpush1.bf16.msra.mxu0 %v3946_v25  ;;  %v4007_v4 = vld [vmem:[%s5976_s1 + $0x204] ss:$16 sps:$4 sm:$0xff]   ;;  %v4010_v5 = vld [vmem:[%s5976_s1 + $0x1ec] ss:$16 sps:$4 sm:$0xff]   ;;  %v4009_v6 = vld [vmem:[%s5976_s1 + $0x200] ss:$16 sps:$4 sm:$0xff]  }
  0x18   :  { %2836 = vmatpush1.bf16.msra.mxu1 %v3945_v24  ;;  %2646 = vmatprep.subr.bf16.mxu0 %v3947_v26  ;;  %v4012_v7 = vld [vmem:[%s5976_s1 + $0x1e8] ss:$16 sps:$4 sm:$0xff]   ;;  %v21_v8 = vld [vmem:[%s5975_s0] sm:$0xff]  ;;  %v4016_v10 = vld [vmem:[%s5976_s1 + $0x20c] ss:$16 sps:$4 sm:$0xff]  }
  0x19   :  { %2838 = vmatprep.subr.bf16.mxu1 %v3949_v27  ;;  %v4013_v9 = vld [vmem:[%s5976_s1 + $0x224] ss:$16 sps:$4 sm:$0xff]   ;;  %v4015_v11 = vld [vmem:[%s5976_s1 + $0x220] ss:$16 sps:$4 sm:$0xff]   ;;  %v4018_v12 = vld [vmem:[%s5976_s1 + $0x208] ss:$16 sps:$4 sm:$0xff]  }
  0x1a   :  { %v4019_v13 = vld [vmem:[%s5976_s1 + $0x244] ss:$16 sps:$4 sm:$0xff]   ;;  %v4022_v14 = vld [vmem:[%s5976_s1 + $0x22c] ss:$16 sps:$4 sm:$0xff]   ;;  %v4021_v15 = vld [vmem:[%s5976_s1 + $0x240] ss:$16 sps:$4 sm:$0xff]  }
  0x1b   :  { %2648 = vmatpush1.bf16.msra.mxu0 %v3952_v29  ;;  %v4024_v16 = vld [vmem:[%s5976_s1 + $0x228] ss:$16 sps:$4 sm:$0xff]   ;;  %v4025_v17 = vld [vmem:[%s5976_s1 + $0x264] ss:$16 sps:$4 sm:$0xff]   ;;  %v4028_v18 = vld [vmem:[%s5976_s1 + $0x24c] ss:$16 sps:$4 sm:$0xff]  }
  0x1c   :  { %2840 = vmatpush1.bf16.msra.mxu1 %v3951_v28  ;;  %2650 = vmatprep.subr.bf16.mxu0 %v3953_v30  ;;  %v4027_v19 = vld [vmem:[%s5976_s1 + $0x260] ss:$16 sps:$4 sm:$0xff]   ;;  %v4030_v20 = vld [vmem:[%s5976_s1 + $0x248] ss:$16 sps:$4 sm:$0xff]   ;;  %v4031_v21 = vld [vmem:[%s5976_s1 + $0x284] ss:$16 sps:$4 sm:$0xff]  }
  0x1d   :  { %2842 = vmatprep.subr.bf16.mxu1 %v3955_v31  ;;  %v4034_v22 = vld [vmem:[%s5976_s1 + $0x26c] ss:$16 sps:$4 sm:$0xff]   ;;  %v4033_v23 = vld [vmem:[%s5976_s1 + $0x280] ss:$16 sps:$4 sm:$0xff]   ;;  %v4036_v24 = vld [vmem:[%s5976_s1 + $0x268] ss:$16 sps:$4 sm:$0xff]  }
  0x1e   :  { %v4037_v25 = vld [vmem:[%s5976_s1 + $0x2a4] ss:$16 sps:$4 sm:$0xff]   ;;  %v4040_v26 = vld [vmem:[%s5976_s1 + $0x28c] ss:$16 sps:$4 sm:$0xff]   ;;  %v4039_v27 = vld [vmem:[%s5976_s1 + $0x2a0] ss:$16 sps:$4 sm:$0xff]  }
  0x1f   :  { %2652 = vmatpush1.bf16.msra.mxu0 %v3958_v33  ;;  %v4042_v28 = vld [vmem:[%s5976_s1 + $0x288] ss:$16 sps:$4 sm:$0xff]   ;;  %v4043_v29 = vld [vmem:[%s5976_s1 + $0x2c4] ss:$16 sps:$4 sm:$0xff]   ;;  %v4046_v30 = vld [vmem:[%s5976_s1 + $0x2ac] ss:$16 sps:$4 sm:$0xff]  }
  0x20   :  { %2844 = vmatpush1.bf16.msra.mxu1 %v3957_v32  ;;  %2654 = vmatprep.subr.bf16.mxu0 %v3959_v34  ;;  %v24_v31 = vld [vmem:[%s5975_s0 + $0x18] sm:$0xff]  ;;  %v4045_v32 = vld [vmem:[%s5976_s1 + $0x2c0] ss:$16 sps:$4 sm:$0xff]   ;;  %v4049_v34 = vld [vmem:[%s5976_s1 + $0x2e4] ss:$16 sps:$4 sm:$0xff]  }
  0x21   :  { %2846 = vmatprep.subr.bf16.mxu1 %v3961_v35  ;;  %v4048_v33 = vld [vmem:[%s5976_s1 + $0x2a8] ss:$16 sps:$4 sm:$0xff]   ;;  %v4052_v35 = vld [vmem:[%s5976_s1 + $0x2cc] ss:$16 sps:$4 sm:$0xff]   ;;  %v4069_v48 = vld [vmem:[%s5976_s1 + $0x340] ss:$16 sps:$4 sm:$0xff]  }
  0x23   :  { %2656 = vmatpush1.bf16.msra.mxu0 %v3964_v37  ;;  %v4054_v37 = vld [vmem:[%s5976_s1 + $0x2c8] ss:$16 sps:$4 sm:$0xff]  }
  0x24   :  { %2848 = vmatpush1.bf16.msra.mxu1 %v3963_v36  ;;  %2658 = vmatprep.subr.bf16.mxu0 %v3965_v38  ;;  %v4051_v36 = vld [vmem:[%s5976_s1 + $0x2e0] ss:$16 sps:$4 sm:$0xff]   ;;  %v4055_v38 = vld [vmem:[%s5976_s1 + $0x304] ss:$16 sps:$4 sm:$0xff]  }
  0x25   :  { %2850 = vmatprep.subr.bf16.mxu1 %v3967_v39  ;;  %v4058_v39 = vld [vmem:[%s5976_s1 + $0x2ec] ss:$16 sps:$4 sm:$0xff]  }
  0x27   :  { %2660 = vmatpush1.bf16.msra.mxu0 %v3970_v41  ;;  %v4060_v41 = vld [vmem:[%s5976_s1 + $0x2e8] ss:$16 sps:$4 sm:$0xff]  }
  0x28   :  { %2852 = vmatpush1.bf16.msra.mxu1 %v3969_v40  ;;  %2662 = vmatprep.subr.bf16.mxu0 %v3971_v42  ;;  %v4057_v40 = vld [vmem:[%s5976_s1 + $0x300] ss:$16 sps:$4 sm:$0xff]   ;;  %v4061_v42 = vld [vmem:[%s5976_s1 + $0x324] ss:$16 sps:$4 sm:$0xff]  }
  0x29   :  { %2854 = vmatprep.subr.bf16.mxu1 %v3973_v43  ;;  %v4064_v43 = vld [vmem:[%s5976_s1 + $0x30c] ss:$16 sps:$4 sm:$0xff]  }
  0x2b   :  { %2664 = vmatpush1.bf16.msra.mxu0 %v3976_v45  ;;  %v4066_v45 = vld [vmem:[%s5976_s1 + $0x308] ss:$16 sps:$4 sm:$0xff]  }
  0x2c   :  { %2856 = vmatpush1.bf16.msra.mxu1 %v3975_v44  ;;  %2666 = vmatprep.subr.bf16.mxu0 %v3977_v46  ;;  %v4063_v44 = vld [vmem:[%s5976_s1 + $0x320] ss:$16 sps:$4 sm:$0xff]   ;;  %v4067_v46 = vld [vmem:[%s5976_s1 + $0x344] ss:$16 sps:$4 sm:$0xff]  }
  0x2d   :  { %2858 = vmatprep.subr.bf16.mxu1 %v3979_v47  ;;  %v4070_v47 = vld [vmem:[%s5976_s1 + $0x32c] ss:$16 sps:$4 sm:$0xff]  }
  0x2f   :  { %2668 = vmatpush1.bf16.msra.mxu0 %v3982_v50  ;;  %v4073_v50 = vld [vmem:[%s5976_s1 + $0x364] ss:$16 sps:$4 sm:$0xff]  }
  0x30   :  { %2860 = vmatpush1.bf16.msra.mxu1 %v3981_v49  ;;  %2670 = vmatprep.subr.bf16.mxu0 %v3983_v51  ;;  %v4072_v49 = vld [vmem:[%s5976_s1 + $0x328] ss:$16 sps:$4 sm:$0xff]   ;;  %v4076_v51 = vld [vmem:[%s5976_s1 + $0x34c] ss:$16 sps:$4 sm:$0xff]  }
  0x31   :  { %2862 = vmatprep.subr.bf16.mxu1 %v3985_v52  ;;  %v4075_v52 = vld [vmem:[%s5976_s1 + $0x360] ss:$16 sps:$4 sm:$0xff]  }
  0x33   :  { %2672 = vmatpush1.bf16.msra.mxu0 %v3988_v54  ;;  %v4079_v54 = vld [vmem:[%s5976_s1 + $0x384] ss:$16 sps:$4 sm:$0xff]  }
  0x34   :  { %2864 = vmatpush1.bf16.msra.mxu1 %v3987_v53  ;;  %2674 = vmatprep.subr.bf16.mxu0 %v3989_v55  ;;  %v4078_v53 = vld [vmem:[%s5976_s1 + $0x348] ss:$16 sps:$4 sm:$0xff]   ;;  %v4082_v55 = vld [vmem:[%s5976_s1 + $0x36c] ss:$16 sps:$4 sm:$0xff]  }
  0x35   :  { %2866 = vmatprep.subr.bf16.mxu1 %v3991_v56  ;;  %v4081_v56 = vld [vmem:[%s5976_s1 + $0x380] ss:$16 sps:$4 sm:$0xff]  }
  0x37   :  { %2676 = vmatpush1.bf16.msra.mxu0 %v3994_v58  ;;  %v4085_v58 = vld [vmem:[%s5976_s1 + $0x3a4] ss:$16 sps:$4 sm:$0xff]  }
  0x38   :  { %2868 = vmatpush1.bf16.msra.mxu1 %v3993_v57  ;;  %2678 = vmatprep.subr.bf16.mxu0 %v3995_v59  ;;  %v4084_v57 = vld [vmem:[%s5976_s1 + $0x368] ss:$16 sps:$4 sm:$0xff]   ;;  %v4088_v59 = vld [vmem:[%s5976_s1 + $0x38c] ss:$16 sps:$4 sm:$0xff]  }
  0x39   :  { %2870 = vmatprep.subr.bf16.mxu1 %v3997_v60  ;;  %v4087_v60 = vld [vmem:[%s5976_s1 + $0x3a0] ss:$16 sps:$4 sm:$0xff]  }
  0x3b   :  { %2680 = vmatpush1.bf16.msra.mxu0 %v4000_v62  ;;  %v4091_v62 = vld [vmem:[%s5976_s1 + $0x3c4] ss:$16 sps:$4 sm:$0xff]  }
  0x3c   :  { %2872 = vmatpush1.bf16.msra.mxu1 %v3999_v61  ;;  %2682 = vmatprep.subr.bf16.mxu0 %v4001_v63  ;;  %v4090_v61 = vld [vmem:[%s5976_s1 + $0x388] ss:$16 sps:$4 sm:$0xff]   ;;  %v4094_v63 = vld [vmem:[%s5976_s1 + $0x3ac] ss:$16 sps:$4 sm:$0xff]  }
  0x3d   :  { %2874 = vmatprep.subr.bf16.mxu1 %v4003_v0  ;;  %v4093_v0 = vld [vmem:[%s5976_s1 + $0x3c0] ss:$16 sps:$4 sm:$0xff]  }
  0x3f   :  { %2684 = vmatpush1.bf16.msra.mxu0 %v4006_v3  ;;  %v4097_v3 = vld [vmem:[%s5976_s1 + $0x3e4] ss:$16 sps:$4 sm:$0xff]  }
  0x40   :  { %2876 = vmatpush1.bf16.msra.mxu1 %v4005_v1  ;;  %2686 = vmatprep.subr.bf16.mxu0 %v4007_v4  ;;  %v4096_v1 = vld [vmem:[%s5976_s1 + $0x3a8] ss:$16 sps:$4 sm:$0xff]   ;;  %v4100_v4 = vld [vmem:[%s5976_s1 + $0x3cc] ss:$16 sps:$4 sm:$0xff]  }
  0x41   :  { %2878 = vmatprep.subr.bf16.mxu1 %v4010_v5  ;;  %v4099_v5 = vld [vmem:[%s5976_s1 + $0x3e0] ss:$16 sps:$4 sm:$0xff]  }
  0x42   :  { %707 = vmatmul.mubr.f32.vlgmr.msra.gmra.mrb[0].mxu0 %v21_v8 }
  0x43   :  { %2688 = vmatpush1.bf16.msra.mxu0 %v4009_v6  ;;  %777 = vmatprep.mubr.f32.mxu0 %v24_v31  ;;  %v4102_v6 = vld [vmem:[%s5976_s1 + $0x3c8] ss:$16 sps:$4 sm:$0xff]  }
  0x44   :  { %2880 = vmatpush1.bf16.msra.mxu1 %v4012_v7  ;;  %2690 = vmatprep.subr.bf16.mxu0 %v4013_v9  ;;  %v4103_v7 = vld [vmem:[%s5976_s1 + $0x404] ss:$16 sps:$4 sm:$0xff]   ;;  %v4105_v9 = vld [vmem:[%s5976_s1 + $0x400] ss:$16 sps:$4 sm:$0xff]  }
  0x45   :  { %2882 = vmatprep.subr.bf16.mxu1 %v4016_v10  ;;  %v4108_v10 = vld [vmem:[%s5976_s1 + $0x3e8] ss:$16 sps:$4 sm:$0xff]  }
  0x47   :  { %991 = vmatmul.mubr.f32.vlgmr.msra.gmra.mrb[2].mxu1 %v21_v8  ;;  %2692 = vmatpush1.bf16.msra.mxu0 %v4015_v11  ;;  %v4106_v8 = vld [vmem:[%s5976_s1 + $0x3ec] ss:$16 sps:$4 sm:$0xff]   ;;  %v23_v11 = vld [vmem:[%s5975_s0 + $0x10] sm:$0xff] }
  0x48   :  { %2884 = vmatpush1.bf16.msra.mxu1 %v4018_v12  ;;  %2694 = vmatprep.subr.bf16.mxu0 %v4019_v13  ;;  %v4109_v12 = vld [vmem:[%s5976_s1 + $0x424] ss:$16 sps:$4 sm:$0xff]   ;;  %v4112_v13 = vld [vmem:[%s5976_s1 + $0x40c] ss:$16 sps:$4 sm:$0xff]  }
  0x49   :  { %2886 = vmatprep.subr.bf16.mxu1 %v4022_v14  ;;  %1061 = vmatprep.mubr.f32.mxu1 %v24_v31  ;;  %v4111_v14 = vld [vmem:[%s5976_s1 + $0x420] ss:$16 sps:$4 sm:$0xff]  }
  0x4a   :  { %v4135_v31 = vld [vmem:[%s5976_s1 + $0x4a0] ss:$16 sps:$4 sm:$0xff]  }
  0x4b   :  { %2696 = vmatpush1.bf16.msra.mxu0 %v4021_v15  ;;  %v26_v15 = vld [vmem:[%s5975_s0 + $0x28] sm:$0xff] }
  0x4c   :  { %2888 = vmatpush1.bf16.msra.mxu1 %v4024_v16  ;;  %2698 = vmatprep.subr.bf16.mxu0 %v4025_v17  ;;  %v4114_v16 = vld [vmem:[%s5976_s1 + $0x408] ss:$16 sps:$4 sm:$0xff]   ;;  %v4115_v17 = vld [vmem:[%s5976_s1 + $0x444] ss:$16 sps:$4 sm:$0xff]  }
  0x4d   :  { %2890 = vmatprep.subr.bf16.mxu1 %v4028_v18  ;;  %v4118_v18 = vld [vmem:[%s5976_s1 + $0x42c] ss:$16 sps:$4 sm:$0xff]  }
  0x4f   :  { %2700 = vmatpush1.bf16.msra.mxu0 %v4027_v19  ;;  %v4117_v19 = vld [vmem:[%s5976_s1 + $0x440] ss:$16 sps:$4 sm:$0xff]  }
  0x50   :  { %2892 = vmatpush1.bf16.msra.mxu1 %v4030_v20  ;;  %2702 = vmatprep.subr.bf16.mxu0 %v4031_v21  ;;  %v4120_v20 = vld [vmem:[%s5976_s1 + $0x428] ss:$16 sps:$4 sm:$0xff]   ;;  %v4121_v21 = vld [vmem:[%s5976_s1 + $0x464] ss:$16 sps:$4 sm:$0xff]  }
  0x51   :  { %2894 = vmatprep.subr.bf16.mxu1 %v4034_v22  ;;  %v4124_v22 = vld [vmem:[%s5976_s1 + $0x44c] ss:$16 sps:$4 sm:$0xff]  }
  0x53   :  { %2704 = vmatpush1.bf16.msra.mxu0 %v4033_v23  ;;  %v4123_v23 = vld [vmem:[%s5976_s1 + $0x460] ss:$16 sps:$4 sm:$0xff]  }
  0x54   :  { %2896 = vmatpush1.bf16.msra.mxu1 %v4036_v24  ;;  %2706 = vmatprep.subr.bf16.mxu0 %v4037_v25  ;;  %v4126_v24 = vld [vmem:[%s5976_s1 + $0x448] ss:$16 sps:$4 sm:$0xff]   ;;  %v4127_v25 = vld [vmem:[%s5976_s1 + $0x484] ss:$16 sps:$4 sm:$0xff]  }
  0x55   :  { %2898 = vmatprep.subr.bf16.mxu1 %v4040_v26  ;;  %v4130_v26 = vld [vmem:[%s5976_s1 + $0x46c] ss:$16 sps:$4 sm:$0xff]  }
  0x57   :  { %2708 = vmatpush1.bf16.msra.mxu0 %v4039_v27  ;;  %v4129_v27 = vld [vmem:[%s5976_s1 + $0x480] ss:$16 sps:$4 sm:$0xff]  }
  0x58   :  { %2900 = vmatpush1.bf16.msra.mxu1 %v4042_v28  ;;  %2710 = vmatprep.subr.bf16.mxu0 %v4043_v29  ;;  %v4132_v28 = vld [vmem:[%s5976_s1 + $0x468] ss:$16 sps:$4 sm:$0xff]   ;;  %v4133_v29 = vld [vmem:[%s5976_s1 + $0x4a4] ss:$16 sps:$4 sm:$0xff]  }
  0x59   :  { %2902 = vmatprep.subr.bf16.mxu1 %v4046_v30  ;;  %v4136_v30 = vld [vmem:[%s5976_s1 + $0x48c] ss:$16 sps:$4 sm:$0xff]  }
  0x5b   :  { %2712 = vmatpush1.bf16.msra.mxu0 %v4045_v32  ;;  %v4138_v32 = vld [vmem:[%s5976_s1 + $0x488] ss:$16 sps:$4 sm:$0xff]  }
  0x5c   :  { %2904 = vmatpush1.bf16.msra.mxu1 %v4048_v33  ;;  %2714 = vmatprep.subr.bf16.mxu0 %v4049_v34  ;;  %v4139_v33 = vld [vmem:[%s5976_s1 + $0x4c4] ss:$16 sps:$4 sm:$0xff]   ;;  %v4142_v34 = vld [vmem:[%s5976_s1 + $0x4ac] ss:$16 sps:$4 sm:$0xff]  }
  0x5d   :  { %2906 = vmatprep.subr.bf16.mxu1 %v4052_v35  ;;  %v4141_v35 = vld [vmem:[%s5976_s1 + $0x4c0] ss:$16 sps:$4 sm:$0xff]  }
  0x5f   :  { %2716 = vmatpush1.bf16.msra.mxu0 %v4051_v36  ;;  %v4144_v36 = vld [vmem:[%s5976_s1 + $0x4a8] ss:$16 sps:$4 sm:$0xff]  }
  0x60   :  { %2908 = vmatpush1.bf16.msra.mxu1 %v4054_v37  ;;  %2718 = vmatprep.subr.bf16.mxu0 %v4055_v38  ;;  %v4145_v37 = vld [vmem:[%s5976_s1 + $0x4e4] ss:$16 sps:$4 sm:$0xff]   ;;  %v4148_v38 = vld [vmem:[%s5976_s1 + $0x4cc] ss:$16 sps:$4 sm:$0xff]  }
  0x61   :  { %2910 = vmatprep.subr.bf16.mxu1 %v4058_v39  ;;  %v4147_v39 = vld [vmem:[%s5976_s1 + $0x4e0] ss:$16 sps:$4 sm:$0xff]  }
  0x63   :  { %2720 = vmatpush1.bf16.msra.mxu0 %v4057_v40  ;;  %v4150_v40 = vld [vmem:[%s5976_s1 + $0x4c8] ss:$16 sps:$4 sm:$0xff]  }
  0x64   :  { %2912 = vmatpush1.bf16.msra.mxu1 %v4060_v41  ;;  %2722 = vmatprep.subr.bf16.mxu0 %v4061_v42  ;;  %v4151_v41 = vld [vmem:[%s5976_s1 + $0x504] ss:$16 sps:$4 sm:$0xff]   ;;  %v4154_v42 = vld [vmem:[%s5976_s1 + $0x4ec] ss:$16 sps:$4 sm:$0xff]  }
  0x65   :  { %2914 = vmatprep.subr.bf16.mxu1 %v4064_v43  ;;  %v4153_v43 = vld [vmem:[%s5976_s1 + $0x500] ss:$16 sps:$4 sm:$0xff]  }
  0x67   :  { %2724 = vmatpush1.bf16.msra.mxu0 %v4063_v44  ;;  %v4156_v44 = vld [vmem:[%s5976_s1 + $0x4e8] ss:$16 sps:$4 sm:$0xff]  }
  0x68   :  { %2916 = vmatpush1.bf16.msra.mxu1 %v4066_v45  ;;  %2726 = vmatprep.subr.bf16.mxu0 %v4067_v46  ;;  %v4157_v45 = vld [vmem:[%s5976_s1 + $0x524] ss:$16 sps:$4 sm:$0xff]   ;;  %v4160_v46 = vld [vmem:[%s5976_s1 + $0x50c] ss:$16 sps:$4 sm:$0xff]  }
  0x69   :  { %2918 = vmatprep.subr.bf16.mxu1 %v4070_v47  ;;  %v4159_v47 = vld [vmem:[%s5976_s1 + $0x520] ss:$16 sps:$4 sm:$0xff]  }
  0x6b   :  { %2728 = vmatpush1.bf16.msra.mxu0 %v4069_v48  ;;  %v4162_v48 = vld [vmem:[%s5976_s1 + $0x508] ss:$16 sps:$4 sm:$0xff]  }
  0x6c   :  { %2920 = vmatpush1.bf16.msra.mxu1 %v4072_v49  ;;  %2730 = vmatprep.subr.bf16.mxu0 %v4073_v50  ;;  %v4163_v49 = vld [vmem:[%s5976_s1 + $0x544] ss:$16 sps:$4 sm:$0xff]   ;;  %v4166_v50 = vld [vmem:[%s5976_s1 + $0x52c] ss:$16 sps:$4 sm:$0xff]  }
  0x6d   :  { %2922 = vmatprep.subr.bf16.mxu1 %v4076_v51  ;;  %v4165_v51 = vld [vmem:[%s5976_s1 + $0x540] ss:$16 sps:$4 sm:$0xff]  }
  0x6f   :  { %2732 = vmatpush1.bf16.msra.mxu0 %v4075_v52  ;;  %v4168_v52 = vld [vmem:[%s5976_s1 + $0x528] ss:$16 sps:$4 sm:$0xff]  }
  0x70   :  { %2924 = vmatpush1.bf16.msra.mxu1 %v4078_v53  ;;  %2734 = vmatprep.subr.bf16.mxu0 %v4079_v54  ;;  %v4169_v53 = vld [vmem:[%s5976_s1 + $0x564] ss:$16 sps:$4 sm:$0xff]   ;;  %v4172_v54 = vld [vmem:[%s5976_s1 + $0x54c] ss:$16 sps:$4 sm:$0xff]  }
  0x71   :  { %2926 = vmatprep.subr.bf16.mxu1 %v4082_v55  ;;  %v4171_v55 = vld [vmem:[%s5976_s1 + $0x560] ss:$16 sps:$4 sm:$0xff]  }
  0x73   :  { %2736 = vmatpush1.bf16.msra.mxu0 %v4081_v56  ;;  %v4174_v56 = vld [vmem:[%s5976_s1 + $0x548] ss:$16 sps:$4 sm:$0xff]  }
  0x74   :  { %2928 = vmatpush1.bf16.msra.mxu1 %v4084_v57  ;;  %2738 = vmatprep.subr.bf16.mxu0 %v4085_v58  ;;  %v4175_v57 = vld [vmem:[%s5976_s1 + $0x584] ss:$16 sps:$4 sm:$0xff]   ;;  %v4178_v58 = vld [vmem:[%s5976_s1 + $0x56c] ss:$16 sps:$4 sm:$0xff]  }
  0x75   :  { %2930 = vmatprep.subr.bf16.mxu1 %v4088_v59  ;;  %v4177_v59 = vld [vmem:[%s5976_s1 + $0x580] ss:$16 sps:$4 sm:$0xff]  }
  0x77   :  { %2740 = vmatpush1.bf16.msra.mxu0 %v4087_v60  ;;  %v4180_v60 = vld [vmem:[%s5976_s1 + $0x568] ss:$16 sps:$4 sm:$0xff]  }
  0x78   :  { %2932 = vmatpush1.bf16.msra.mxu1 %v4090_v61  ;;  %2742 = vmatprep.subr.bf16.mxu0 %v4091_v62  ;;  %v4181_v61 = vld [vmem:[%s5976_s1 + $0x5a4] ss:$16 sps:$4 sm:$0xff]   ;;  %v4184_v62 = vld [vmem:[%s5976_s1 + $0x58c] ss:$16 sps:$4 sm:$0xff]  }
  0x79   :  { %2934 = vmatprep.subr.bf16.mxu1 %v4094_v63  ;;  %v4183_v63 = vld [vmem:[%s5976_s1 + $0x5a0] ss:$16 sps:$4 sm:$0xff]  }
  0x7b   :  { %2744 = vmatpush1.bf16.msra.mxu0 %v4093_v0  ;;  %v4186_v0 = vld [vmem:[%s5976_s1 + $0x588] ss:$16 sps:$4 sm:$0xff]  }
  0x7c   :  { %2936 = vmatpush1.bf16.msra.mxu1 %v4096_v1  ;;  %2746 = vmatprep.subr.bf16.mxu0 %v4097_v3  ;;  %v4187_v1 = vld [vmem:[%s5976_s1 + $0x5c4] ss:$16 sps:$4 sm:$0xff]   ;;  %v4190_v3 = vld [vmem:[%s5976_s1 + $0x5ac] ss:$16 sps:$4 sm:$0xff]  }
  0x7d   :  { %2938 = vmatprep.subr.bf16.mxu1 %v4100_v4  ;;  %v4189_v4 = vld [vmem:[%s5976_s1 + $0x5c0] ss:$16 sps:$4 sm:$0xff]  }
  0x7f   :  { %2748 = vmatpush1.bf16.msra.mxu0 %v4099_v5  ;;  %v4192_v5 = vld [vmem:[%s5976_s1 + $0x5a8] ss:$16 sps:$4 sm:$0xff]  }
  0x80   :  { %2940 = vmatpush1.bf16.msra.mxu1 %v4102_v6  ;;  %2750 = vmatprep.subr.bf16.mxu0 %v4103_v7  ;;  %v4193_v6 = vld [vmem:[%s5976_s1 + $0x5e4] ss:$16 sps:$4 sm:$0xff]   ;;  %v4196_v7 = vld [vmem:[%s5976_s1 + $0x5cc] ss:$16 sps:$4 sm:$0xff]  }
  0x81   :  { %2942 = vmatprep.subr.bf16.mxu1 %v4106_v8  ;;  %v4195_v8 = vld [vmem:[%s5976_s1 + $0x5e0] ss:$16 sps:$4 sm:$0xff]  }
  0x82   :  { %778 = vmatmul.mubr.f32.vlgmr.msra.gmra.mrb[0].mxu0 %v23_v11 }
  0x83   :  { %2752 = vmatpush1.bf16.msra.mxu0 %v4105_v9  ;;  %848 = vmatprep.mubr.f32.mxu0 %v26_v15  ;;  %v4198_v9 = vld [vmem:[%s5976_s1 + $0x5c8] ss:$16 sps:$4 sm:$0xff]  }
  0x84   :  { %2944 = vmatpush1.bf16.msra.mxu1 %v4108_v10  ;;  %2754 = vmatprep.subr.bf16.mxu0 %v4109_v12  ;;  %v4199_v10 = vld [vmem:[%s5976_s1 + $0x5ec] ss:$16 sps:$4 sm:$0xff]   ;;  %v25_v12 = vld [vmem:[%s5975_s0 + $0x20] sm:$0xff] }
  0x85   :  { %2946 = vmatprep.subr.bf16.mxu1 %v4112_v13  ;;  %v4201_v13 = vld [vmem:[%s5976_s1 + $0x5e8] ss:$16 sps:$4 sm:$0xff]  }
  0x87   :  { %1062 = vmatmul.mubr.f32.vlgmr.msra.gmra.mrb[2].mxu1 %v23_v11  ;;  %2756 = vmatpush1.bf16.msra.mxu0 %v4111_v14  ;;  %v4205_v11 = vld [vmem:[%s5978_s3 + $0x4] ss:$28 sps:$4 sm:$0xff]  }
  0x88   :  { %2948 = vmatpush1.bf16.msra.mxu1 %v4114_v16  ;;  %2758 = vmatprep.subr.bf16.mxu0 %v4115_v17  ;;  %v4207_v14 = vld [vmem:[%s5978_s3] ss:$28 sps:$4 sm:$0xff]   ;;  %v4204_v17 = vld [vmem:[%s5976_s1 + $0x608] ss:$16 sps:$4 sm:$0xff]  }
  0x89   :  { %2950 = vmatprep.subr.bf16.mxu1 %v4118_v18  ;;  %1132 = vmatprep.mubr.f32.mxu1 %v26_v15  ;;  %v4202_v15 = vld [vmem:[%s5976_s1 + $0x60c] ss:$16 sps:$4 sm:$0xff]  }
  0x8a   :  { %v4211_v16 = vld [vmem:[%s5978_s3 + $0x3c] ss:$28 sps:$4 sm:$0xff]   ;;  %v4208_v18 = vld [vmem:[%s5978_s3 + $0xc] ss:$28 sps:$4 sm:$0xff]  }
  0x8b   :  { %2760 = vmatpush1.bf16.msra.mxu0 %v4117_v19  ;;  %v4213_v19 = vld [vmem:[%s5978_s3 + $0x38] ss:$28 sps:$4 sm:$0xff]  }
  0x8c   :  { %2952 = vmatpush1.bf16.msra.mxu1 %v4120_v20  ;;  %2762 = vmatprep.subr.bf16.mxu0 %v4121_v21  ;;  %v4217_v20 = vld [vmem:[%s5978_s3 + $0x74] ss:$28 sps:$4 sm:$0xff]  }
  0x8d   :  { %2954 = vmatprep.subr.bf16.mxu1 %v4124_v22  ;;  %v4219_v21 = vld [vmem:[%s5978_s3 + $0x70] ss:$28 sps:$4 sm:$0xff]  }
  0x8e   :  { %v4223_v22 = vld [vmem:[%s5978_s3 + $0xac] ss:$28 sps:$4 sm:$0xff]  }
  0x8f   :  { %2764 = vmatpush1.bf16.msra.mxu0 %v4123_v23  ;;  %v4210_v23 = vld [vmem:[%s5978_s3 + $0x8] ss:$28 sps:$4 sm:$0xff]  }
  0x90   :  { %2956 = vmatpush1.bf16.msra.mxu1 %v4126_v24  ;;  %2766 = vmatprep.subr.bf16.mxu0 %v4127_v25  ;;  %v4214_v24 = vld [vmem:[%s5978_s3 + $0x44] ss:$28 sps:$4 sm:$0xff]  }
  0x91   :  { %2958 = vmatprep.subr.bf16.mxu1 %v4130_v26  ;;  %v4225_v25 = vld [vmem:[%s5978_s3 + $0xa8] ss:$28 sps:$4 sm:$0xff]   ;;  %v4216_v26 = vld [vmem:[%s5978_s3 + $0x40] ss:$28 sps:$4 sm:$0xff]  }
  0x93   :  { %2768 = vmatpush1.bf16.msra.mxu0 %v4129_v27  ;;  %v4547_v27 = vld [vmem:[%s5975_s0 + $0x30] sm:$0xff] }
  0x94   :  { %2960 = vmatpush1.bf16.msra.mxu1 %v4132_v28  ;;  %2770 = vmatprep.subr.bf16.mxu0 %v4133_v29  ;;  %v4220_v28 = vld [vmem:[%s5978_s3 + $0x7c] ss:$28 sps:$4 sm:$0xff]  }
  0x95   :  { %2962 = vmatprep.subr.bf16.mxu1 %v4136_v30  ;;  %v4231_v29 = vld [vmem:[%s5978_s3 + $0xe0] ss:$28 sps:$4 sm:$0xff]  }
  0x96   :  { %v4235_v30 = vld [vmem:[%s5978_s3 + $0x11c] ss:$28 sps:$4 sm:$0xff]  }
  0x97   :  { %2772 = vmatpush1.bf16.msra.mxu0 %v4135_v31  ;;  %v4222_v31 = vld [vmem:[%s5978_s3 + $0x78] ss:$28 sps:$4 sm:$0xff]  }
  0x98   :  { %2964 = vmatpush1.bf16.msra.mxu1 %v4138_v32  ;;  %2774 = vmatprep.subr.bf16.mxu0 %v4139_v33  ;;  %v4226_v32 = vld [vmem:[%s5978_s3 + $0xb4] ss:$28 sps:$4 sm:$0xff]  }
  0x99   :  { %2966 = vmatprep.subr.bf16.mxu1 %v4142_v34  ;;  %v4237_v33 = vld [vmem:[%s5978_s3 + $0x118] ss:$28 sps:$4 sm:$0xff]  }
  0x9a   :  { %v4241_v34 = vld [vmem:[%s5978_s3 + $0x154] ss:$28 sps:$4 sm:$0xff]  }
  0x9b   :  { %2776 = vmatpush1.bf16.msra.mxu0 %v4141_v35  ;;  %v4228_v35 = vld [vmem:[%s5978_s3 + $0xb0] ss:$28 sps:$4 sm:$0xff]  }
  0x9c   :  { %2968 = vmatpush1.bf16.msra.mxu1 %v4144_v36  ;;  %2778 = vmatprep.subr.bf16.mxu0 %v4145_v37  ;;  %v4232_v36 = vld [vmem:[%s5978_s3 + $0xec] ss:$28 sps:$4 sm:$0xff]  }
  0x9d   :  { %2970 = vmatprep.subr.bf16.mxu1 %v4148_v38  ;;  %v4243_v37 = vld [vmem:[%s5978_s3 + $0x150] ss:$28 sps:$4 sm:$0xff]  }
  0x9e   :  { %v4247_v38 = vld [vmem:[%s5978_s3 + $0x18c] ss:$28 sps:$4 sm:$0xff]  }
  0x9f   :  { %2780 = vmatpush1.bf16.msra.mxu0 %v4147_v39 }
  0xa0   :  { %2972 = vmatpush1.bf16.msra.mxu1 %v4150_v40  ;;  %2782 = vmatprep.subr.bf16.mxu0 %v4151_v41  ;;  %v4234_v40 = vld [vmem:[%s5978_s3 + $0xe8] ss:$28 sps:$4 sm:$0xff]  }
  0xa1   :  { %2974 = vmatprep.subr.bf16.mxu1 %v4154_v42  ;;  %v4238_v42 = vld [vmem:[%s5978_s3 + $0x124] ss:$28 sps:$4 sm:$0xff]  }
  0xa3   :  { %2784 = vmatpush1.bf16.msra.mxu0 %v4153_v43  ;;  %v4249_v43 = vld [vmem:[%s5978_s3 + $0x188] ss:$28 sps:$4 sm:$0xff]  }
  0xa4   :  { %2976 = vmatpush1.bf16.msra.mxu1 %v4156_v44  ;;  %2786 = vmatprep.subr.bf16.mxu0 %v4157_v45  ;;  %v4253_v44 = vld [vmem:[%s5978_s3 + $0x1c4] ss:$28 sps:$4 sm:$0xff]  }
  0xa5   :  { %2978 = vmatprep.subr.bf16.mxu1 %v4160_v46  ;;  %v4240_v45 = vld [vmem:[%s5978_s3 + $0x120] ss:$28 sps:$4 sm:$0xff]  }
  0xa6   :  { %v4244_v46 = vld [vmem:[%s5978_s3 + $0x15c] ss:$28 sps:$4 sm:$0xff]  }
  0xa7   :  { %2788 = vmatpush1.bf16.msra.mxu0 %v4159_v47  ;;  %v4255_v47 = vld [vmem:[%s5978_s3 + $0x1c0] ss:$28 sps:$4 sm:$0xff]  }
  0xa8   :  { %2980 = vmatpush1.bf16.msra.mxu1 %v4162_v48  ;;  %2790 = vmatprep.subr.bf16.mxu0 %v4163_v49  ;;  %v4259_v48 = vld [vmem:[%s5978_s3 + $0x1fc] ss:$28 sps:$4 sm:$0xff]  }
  0xa9   :  { %2982 = vmatprep.subr.bf16.mxu1 %v4166_v50  ;;  %v4246_v49 = vld [vmem:[%s5978_s3 + $0x158] ss:$28 sps:$4 sm:$0xff]  }
  0xaa   :  { %v4250_v50 = vld [vmem:[%s5978_s3 + $0x194] ss:$28 sps:$4 sm:$0xff]  }
  0xab   :  { %2792 = vmatpush1.bf16.msra.mxu0 %v4165_v51  ;;  %v4261_v51 = vld [vmem:[%s5978_s3 + $0x1f8] ss:$28 sps:$4 sm:$0xff]  }
  0xac   :  { %2984 = vmatpush1.bf16.msra.mxu1 %v4168_v52  ;;  %2794 = vmatprep.subr.bf16.mxu0 %v4169_v53  ;;  %v4265_v52 = vld [vmem:[%s5978_s3 + $0x234] ss:$28 sps:$4 sm:$0xff]  }
  0xad   :  { %2986 = vmatprep.subr.bf16.mxu1 %v4172_v54  ;;  %v4252_v53 = vld [vmem:[%s5978_s3 + $0x190] ss:$28 sps:$4 sm:$0xff]  }
  0xae   :  { %v4256_v54 = vld [vmem:[%s5978_s3 + $0x1cc] ss:$28 sps:$4 sm:$0xff]  }
  0xaf   :  { %2796 = vmatpush1.bf16.msra.mxu0 %v4171_v55  ;;  %v4267_v55 = vld [vmem:[%s5978_s3 + $0x230] ss:$28 sps:$4 sm:$0xff]  }
  0xb0   :  { %2988 = vmatpush1.bf16.msra.mxu1 %v4174_v56  ;;  %2798 = vmatprep.subr.bf16.mxu0 %v4175_v57  ;;  %v4271_v56 = vld [vmem:[%s5978_s3 + $0x26c] ss:$28 sps:$4 sm:$0xff]  }
  0xb1   :  { %2990 = vmatprep.subr.bf16.mxu1 %v4178_v58 }
  0xb3   :  { %2800 = vmatpush1.bf16.msra.mxu0 %v4177_v59 }
  0xb4   :  { %2992 = vmatpush1.bf16.msra.mxu1 %v4180_v60  ;;  %2802 = vmatprep.subr.bf16.mxu0 %v4181_v61 }
  0xb5   :  { %2994 = vmatprep.subr.bf16.mxu1 %v4184_v62 }
  0xb7   :  { %2804 = vmatpush1.bf16.msra.mxu0 %v4183_v63 }
  0xb8   :  { %2996 = vmatpush1.bf16.msra.mxu1 %v4186_v0  ;;  %2806 = vmatprep.subr.bf16.mxu0 %v4187_v1 }
  0xb9   :  { %2998 = vmatprep.subr.bf16.mxu1 %v4190_v3 }
  0xbb   :  { %2808 = vmatpush1.bf16.msra.mxu0 %v4189_v4 }
  0xbc   :  { %3000 = vmatpush1.bf16.msra.mxu1 %v4192_v5  ;;  %2810 = vmatprep.subr.bf16.mxu0 %v4193_v6 }
  0xbd   :  { %3002 = vmatprep.subr.bf16.mxu1 %v4196_v7 }
  0xbf   :  { %2812 = vmatpush1.bf16.msra.mxu0 %v4195_v8 }
  0xc0   :  { %3004 = vmatpush1.bf16.msra.mxu1 %v4198_v9  ;;  %3014 = vmatprep.subr.bf16.mxu0 %v4205_v11 }
  0xc1   :  { %3006 = vmatprep.subr.bf16.mxu1 %v4199_v10 }
  0xc2   :  { %849 = vmatmul.mubr.f32.vlgmr.msra.gmra.mrb[0].mxu0 %v25_v12 }
  0xc3   :  { %3016 = vmatpush1.bf16.msra.mxu0 %v4207_v14 }
  0xc4   :  { %3008 = vmatpush1.bf16.msra.mxu1 %v4201_v13  ;;  %3018 = vmatprep.subr.bf16.mxu0 %v4211_v16 }
  0xc5   :  { %3010 = vmatprep.subr.bf16.mxu1 %v4202_v15 }
  0xc7   :  { %1133 = vmatmul.mubr.f32.vlgmr.msra.gmra.mrb[2].mxu1 %v25_v12  ;;  %3020 = vmatpush1.bf16.msra.mxu0 %v4213_v19 }
  0xc8   :  { %3012 = vmatpush1.bf16.msra.mxu1 %v4204_v17  ;;  %1203 = vmatprep.mubr.f32.mxu1 %v4572_v2  ;;  %v4229_v2 = vld [vmem:[%s5978_s3 + $0xe4] ss:$28 sps:$4 sm:$0xff]  }
  0xc9   :  { %3142 = vmatprep.subr.bf16.mxu1 %v4208_v18  ;;  %3022 = vmatprep.subr.bf16.mxu0 %v4217_v20 }
  0xcb   :  { %3024 = vmatpush1.bf16.msra.mxu0 %v4219_v21 }
  0xcc   :  { %3026 = vmatprep.subr.bf16.mxu0 %v4223_v22 }
  0xcf   :  { %2550 = vmatmul.mubr.msk.f32.vlgmr.msra.gmra.mrb[2].mxu1 %vm638_vm0, %v4547_v27  ;;  %3028 = vmatpush1.bf16.msra.mxu0 %v4225_v25 }
  0xd0   :  { %3144 = vmatpush1.bf16.msra.mxu1 %v4210_v23  ;;  %3030 = vmatprep.subr.bf16.mxu0 %v4229_v2 }
  0xd1   :  { %3146 = vmatprep.subr.bf16.mxu1 %v4214_v24 }
  0xd3   :  { %3032 = vmatpush1.bf16.msra.mxu0 %v4231_v29 }
  0xd4   :  { %3148 = vmatpush1.bf16.msra.mxu1 %v4216_v26  ;;  %3034 = vmatprep.subr.bf16.mxu0 %v4235_v30 }
  0xd5   :  { %3150 = vmatprep.subr.bf16.mxu1 %v4220_v28 }
  0xd7   :  { %3036 = vmatpush1.bf16.msra.mxu0 %v4237_v33 }
  0xd8   :  { %3152 = vmatpush1.bf16.msra.mxu1 %v4222_v31  ;;  %3038 = vmatprep.subr.bf16.mxu0 %v4241_v34 }
  0xd9   :  { %3154 = vmatprep.subr.bf16.mxu1 %v4226_v32 }
  0xda   :  { %v5292_v39 = vpop.f32.mrb[0].mxu1 }
  0xdb   :  { %v5297_v41 = vpop.f32.mrb[1].mxu1  ;;  %3040 = vmatpush1.bf16.msra.mxu0 %v4243_v37 }
  0xdc   :  { %3156 = vmatpush1.bf16.msra.mxu1 %v4228_v35  ;;  %3042 = vmatprep.subr.bf16.mxu0 %v4247_v38 }
  0xdd   :  { %3158 = vmatprep.subr.bf16.mxu1 %v4232_v36 }
  0xdf   :  { %3044 = vmatpush1.bf16.msra.mxu0 %v4249_v43 }
  0xe0   :  { %3160 = vmatpush1.bf16.msra.mxu1 %v4234_v40  ;;  %3046 = vmatprep.subr.bf16.mxu0 %v4253_v44 }
  0xe1   :  { %3162 = vmatprep.subr.bf16.mxu1 %v4238_v42 }
  0xe3   :  { %3048 = vmatpush1.bf16.msra.mxu0 %v4255_v47 }
  0xe4   :  { %3164 = vmatpush1.bf16.msra.mxu1 %v4240_v45  ;;  %3050 = vmatprep.subr.bf16.mxu0 %v4259_v48 }
  0xe5   :  { %3166 = vmatprep.subr.bf16.mxu1 %v4244_v46 }
  0xe7   :  { %3052 = vmatpush1.bf16.msra.mxu0 %v4261_v51 }
  0xe8   :  { %3168 = vmatpush1.bf16.msra.mxu1 %v4246_v49  ;;  %3054 = vmatprep.subr.bf16.mxu0 %v4265_v52 }
  0xe9   :  { %3170 = vmatprep.subr.bf16.mxu1 %v4250_v50 }
  0xea   :  { %10 = vsyncpa [#allocation3], 0  ;;  %v4258_v57 = vld [vmem:[%s5978_s3 + $0x1c8] ss:$28 sps:$4 sm:$0xff]   ;;  %v4264_v60 = vld [vmem:[%s5978_s3 + $0x200] ss:$28 sps:$4 sm:$0xff]   ;;  %v618_v20 = vlaneseq }
  0xeb   :  { %v4262_v58 = vld [vmem:[%s5978_s3 + $0x204] ss:$28 sps:$4 sm:$0xff]   ;;  %3056 = vmatpush1.bf16.msra.mxu0 %v4267_v55  ;;  %v4268_v61 = vld [vmem:[%s5978_s3 + $0x23c] ss:$28 sps:$4 sm:$0xff]   ;;  %v4274_v63 = vld [vmem:[%s5978_s3 + $0x274] ss:$28 sps:$4 sm:$0xff]  }
  0xec   :  { %3172 = vmatpush1.bf16.msra.mxu1 %v4252_v53  ;;  %v4273_v59 = vld [vmem:[%s5978_s3 + $0x268] ss:$28 sps:$4 sm:$0xff]   ;;  %3058 = vmatprep.subr.bf16.mxu0 %v4271_v56  ;;  %v4270_v62 = vld [vmem:[%s5978_s3 + $0x238] ss:$28 sps:$4 sm:$0xff]   ;;  %v4276_v0 = vld [vmem:[%s5978_s3 + $0x270] ss:$28 sps:$4 sm:$0xff]  }
  0xed   :  { %3174 = vmatprep.subr.bf16.mxu1 %v4256_v54  ;;  %v4277_v1 = vld [vmem:[%s5978_s3 + $0x2a4] ss:$28 sps:$4 sm:$0xff]   ;;  %v4280_v3 = vld [vmem:[%s5978_s3 + $0x2ac] ss:$28 sps:$4 sm:$0xff]   ;;  %v4283_v6 = vld [vmem:[%s5978_s3 + $0x2dc] ss:$28 sps:$4 sm:$0xff]  }
  0xee   :  { %v4279_v4 = vld [vmem:[%s5978_s3 + $0x2a0] ss:$28 sps:$4 sm:$0xff]   ;;  %v4282_v5 = vld [vmem:[%s5978_s3 + $0x2a8] ss:$28 sps:$4 sm:$0xff]   ;;  %v4285_v8 = vld [vmem:[%s5978_s3 + $0x2d8] ss:$28 sps:$4 sm:$0xff]  }
  0xef   :  { %3060 = vmatpush1.bf16.msra.mxu0 %v4273_v59  ;;  %v4286_v7 = vld [vmem:[%s5978_s3 + $0x2e4] ss:$28 sps:$4 sm:$0xff]   ;;  %v4289_v10 = vld [vmem:[%s5978_s3 + $0x314] ss:$28 sps:$4 sm:$0xff]   ;;  %v4292_v12 = vld [vmem:[%s5978_s3 + $0x31c] ss:$28 sps:$4 sm:$0xff]  }
  0xf0   :  { %3176 = vmatpush1.bf16.msra.mxu1 %v4258_v57  ;;  %3062 = vmatprep.subr.bf16.mxu0 %v4277_v1  ;;  %v4288_v9 = vld [vmem:[%s5978_s3 + $0x2e0] ss:$28 sps:$4 sm:$0xff]   ;;  %v4291_v11 = vld [vmem:[%s5978_s3 + $0x310] ss:$28 sps:$4 sm:$0xff]   ;;  %v4294_v13 = vld [vmem:[%s5978_s3 + $0x318] ss:$28 sps:$4 sm:$0xff]  }
  0xf1   :  { %3178 = vmatprep.subr.bf16.mxu1 %v4262_v58  ;;  %v4295_v14 = vld [vmem:[%s5978_s3 + $0x34c] ss:$28 sps:$4 sm:$0xff]   ;;  %v4298_v15 = vld [vmem:[%s5978_s3 + $0x354] ss:$28 sps:$4 sm:$0xff]   ;;  %v4301_v18 = vld [vmem:[%s5978_s3 + $0x384] ss:$28 sps:$4 sm:$0xff]  }
  0xf2   :  { %v4297_v16 = vld [vmem:[%s5978_s3 + $0x348] ss:$28 sps:$4 sm:$0xff]   ;;  %v4300_v17 = vld [vmem:[%s5978_s3 + $0x350] ss:$28 sps:$4 sm:$0xff]   ;;  %v5422_v21 = vshrl.u32 %v618_v20, 7 }
  0xf3   :  { %3064 = vmatpush1.bf16.msra.mxu0 %v4279_v4  ;;  %v4304_v19 = vld [vmem:[%s5978_s3 + $0x38c] ss:$28 sps:$4 sm:$0xff]   ;;  %v5428_v23 = vld [vmem:[%s5977_s2] sm:$0xf]  ;;  %v4307_v40 = vld [vmem:[%s5978_s3 + $0x3bc] ss:$28 sps:$4 sm:$0xff]  }
  0xf4   :  { %3180 = vmatpush1.bf16.msra.mxu1 %v4264_v60  ;;  %3066 = vmatprep.subr.bf16.mxu0 %v4283_v6  ;;  %v620_v22 = vsub.s32 0, %v5422_v21  ;;  %v624_v24 = vsub.s32 1, %v5422_v21  ;;  %v632_v32 = vsub.s32 3, %v5422_v21  ;;  %v4303_v37 = vld [vmem:[%s5978_s3 + $0x380] ss:$28 sps:$4 sm:$0xff]  }
  0xf5   :  { %3182 = vmatprep.subr.bf16.mxu1 %v4268_v61  ;;  %v4306_v38 = vld [vmem:[%s5978_s3 + $0x388] ss:$28 sps:$4 sm:$0xff]   ;;  %v4309_v43 = vld [vmem:[%s5978_s3 + $0x3b8] ss:$28 sps:$4 sm:$0xff]   ;;  %v4312_v44 = vld [vmem:[%s5978_s3 + $0x3c0] ss:$28 sps:$4 sm:$0xff]  }
  0xf6   :  { %v621_v25 = vrot.slane %v5428_v23, %v620_v22  ;;  %v625_v2 = vrot.slane %v5428_v23, %v624_v24  ;;  %v633_v33 = vrot.slane %v5428_v23, %v632_v32  ;;  %v4313_v45 = vld [vmem:[%s5978_s3 + $0x3f4] ss:$28 sps:$4 sm:$0xff]   ;;  %v4316_v46 = vld [vmem:[%s5978_s3 + $0x3fc] ss:$28 sps:$4 sm:$0xff]   ;;  %v4319_v49 = vld [vmem:[%s5978_s3 + $0x42c] ss:$28 sps:$4 sm:$0xff]  }
  0xf7   :  { %3068 = vmatpush1.bf16.msra.mxu0 %v4285_v8  ;;  %v4315_v47 = vld [vmem:[%s5978_s3 + $0x3f0] ss:$28 sps:$4 sm:$0xff]   ;;  %v4318_v48 = vld [vmem:[%s5978_s3 + $0x3f8] ss:$28 sps:$4 sm:$0xff]   ;;  %v4321_v52 = vld [vmem:[%s5978_s3 + $0x428] ss:$28 sps:$4 sm:$0xff]  }
  0xf8   :  { %3184 = vmatpush1.bf16.msra.mxu1 %v4270_v62  ;;  %3070 = vmatprep.subr.bf16.mxu0 %v4289_v10  ;;  %v4322_v50 = vld [vmem:[%s5978_s3 + $0x434] ss:$28 sps:$4 sm:$0xff]   ;;  %v4325_v54 = vld [vmem:[%s5978_s3 + $0x464] ss:$28 sps:$4 sm:$0xff]   ;;  %v4328_v55 = vld [vmem:[%s5978_s3 + $0x46c] ss:$28 sps:$4 sm:$0xff]  }
  0xf9   :  { %3186 = vmatprep.subr.bf16.mxu1 %v4274_v63  ;;  %v4324_v53 = vld [vmem:[%s5978_s3 + $0x430] ss:$28 sps:$4 sm:$0xff]   ;;  %v4327_v56 = vld [vmem:[%s5978_s3 + $0x460] ss:$28 sps:$4 sm:$0xff]   ;;  %v4330_v57 = vld [vmem:[%s5978_s3 + $0x468] ss:$28 sps:$4 sm:$0xff]  }
  0xfa   :  { %v4331_v58 = vld [vmem:[%s5978_s3 + $0x49c] ss:$28 sps:$4 sm:$0xff]   ;;  %v4334_v59 = vld [vmem:[%s5978_s3 + $0x4a4] ss:$28 sps:$4 sm:$0xff]   ;;  %v4337_v62 = vld [vmem:[%s5978_s3 + $0x4d4] ss:$28 sps:$4 sm:$0xff]  }
  0xfb   :  { %3072 = vmatpush1.bf16.msra.mxu0 %v4291_v11  ;;  %v4333_v60 = vld [vmem:[%s5978_s3 + $0x498] ss:$28 sps:$4 sm:$0xff]   ;;  %v4336_v61 = vld [vmem:[%s5978_s3 + $0x4a0] ss:$28 sps:$4 sm:$0xff]   ;;  %v4348_v6 = vld [vmem:[%s5978_s3 + $0x510] ss:$28 sps:$4 sm:$0xff]  }
  0xfc   :  { %3188 = vmatpush1.bf16.msra.mxu1 %v4276_v0  ;;  %3074 = vmatprep.subr.bf16.mxu0 %v4295_v14  ;;  %v4340_v63 = vld [vmem:[%s5978_s3 + $0x4dc] ss:$28 sps:$4 sm:$0xff]   ;;  %v4339_v0 = vld [vmem:[%s5978_s3 + $0x4d0] ss:$28 sps:$4 sm:$0xff]   ;;  %v4354_v10 = vld [vmem:[%s5978_s3 + $0x548] ss:$28 sps:$4 sm:$0xff]  }
  0xfd   :  { %3190 = vmatprep.subr.bf16.mxu1 %v4280_v3  ;;  %v4342_v1 = vld [vmem:[%s5978_s3 + $0x4d8] ss:$28 sps:$4 sm:$0xff]   ;;  %v4343_v3 = vld [vmem:[%s5978_s3 + $0x50c] ss:$28 sps:$4 sm:$0xff]   ;;  %v4360_v14 = vld [vmem:[%s5978_s3 + $0x580] ss:$28 sps:$4 sm:$0xff]  }
  0xfe   :  { %v4346_v4 = vld [vmem:[%s5978_s3 + $0x514] ss:$28 sps:$4 sm:$0xff]   ;;  %v4352_v8 = vld [vmem:[%s5978_s3 + $0x54c] ss:$28 sps:$4 sm:$0xff]   ;;  %v4355_v11 = vld [vmem:[%s5978_s3 + $0x57c] ss:$28 sps:$4 sm:$0xff]  }
  0xff   :  { %3076 = vmatpush1.bf16.msra.mxu0 %v4297_v16  ;;  %v4364_v16 = vld [vmem:[%s5978_s3 + $0x5bc] ss:$28 sps:$4 sm:$0xff]   ;;  %v4370_v20 = vld [vmem:[%s5978_s3 + $0x5f4] ss:$28 sps:$4 sm:$0xff]  }
 0x100   :  { %3192 = vmatpush1.bf16.msra.mxu1 %v4282_v5  ;;  %3078 = vmatprep.subr.bf16.mxu0 %v4301_v18  ;;  %v4345_v5 = vld [vmem:[%s5978_s3 + $0x508] ss:$28 sps:$4 sm:$0xff]   ;;  %v4366_v18 = vld [vmem:[%s5978_s3 + $0x5b8] ss:$28 sps:$4 sm:$0xff]  }
 0x101   :  { %3194 = vmatprep.subr.bf16.mxu1 %v4286_v7  ;;  %v4349_v7 = vld [vmem:[%s5978_s3 + $0x544] ss:$28 sps:$4 sm:$0xff]  }
 0x104   :  { %3196 = vmatpush1.bf16.msra.mxu1 %v4288_v9  ;;  %v4351_v9 = vld [vmem:[%s5978_s3 + $0x540] ss:$28 sps:$4 sm:$0xff]  }
 0x105   :  { %3198 = vmatprep.subr.bf16.mxu1 %v4292_v12  ;;  %v4358_v12 = vld [vmem:[%s5978_s3 + $0x584] ss:$28 sps:$4 sm:$0xff]  }
 0x108   :  { %3200 = vmatpush1.bf16.msra.mxu1 %v4294_v13  ;;  %v4357_v13 = vld [vmem:[%s5978_s3 + $0x578] ss:$28 sps:$4 sm:$0xff]  }
 0x109   :  { %3202 = vmatprep.subr.bf16.mxu1 %v4298_v15  ;;  %v4361_v15 = vld [vmem:[%s5978_s3 + $0x5b4] ss:$28 sps:$4 sm:$0xff]  }
 0x10c   :  { %3204 = vmatpush1.bf16.msra.mxu1 %v4300_v17  ;;  %v4363_v17 = vld [vmem:[%s5978_s3 + $0x5b0] ss:$28 sps:$4 sm:$0xff]  }
 0x10d   :  { %3206 = vmatprep.subr.bf16.mxu1 %v4304_v19  ;;  %v4367_v19 = vld [vmem:[%s5978_s3 + $0x5ec] ss:$28 sps:$4 sm:$0xff]  }
 0x195   :  { %v850_v26 = vpop.f32.mrb[0].mxu0 }
 0x196   :  { %v3461_v27 = vadd.f32 %v850_v26, %v621_v25  ;;  %v852_v28 = vpop.f32.mrb[1].mxu0  ;;  %v628_v25 = vsub.s32 2, %v5422_v21  ;;  %v4372_v26 = vld [vmem:[%s5978_s3 + $0x5f0] ss:$28 sps:$4 sm:$0xff]  }
 0x197   :  { %v3463_v29 = vadd.f32 %v852_v28, %v625_v2  ;;  %v4369_v2 = vld [vmem:[%s5978_s3 + $0x5e8] ss:$28 sps:$4 sm:$0xff]  }
 0x198   :  { %v3462_v30 = vadd.f32 %v3461_v27, %v5292_v39  ;;  %v4373_v27 = vld [vmem:[%s5978_s3 + $0x624] ss:$28 sps:$4 sm:$0xff]   ;;  %v4376_v28 = vld [vmem:[%s5978_s3 + $0x62c] ss:$28 sps:$4 sm:$0xff]  }
 0x199   :  { %v3464_v31 = vadd.f32 %v3463_v29, %v5297_v41  ;;  %v4310_v41 = vld [vmem:[%s5978_s3 + $0x3c4] ss:$28 sps:$4 sm:$0xff]   ;;  %v629_v29 = vrot.slane %v5428_v23, %v628_v25 }
 0x19a   :  { %v4382_v23 = vld [vmem:[%s5978_s3 + $0x664] ss:$28 sps:$4 sm:$0xff]  }
 0x19b   :  { %4525 = vtanh.f32 %v3464_v31  ;;  %v4378_v31 = vld [vmem:[%s5978_s3 + $0x628] ss:$28 sps:$4 sm:$0xff]  }
 0x19c   :  { %4527 = vtanh.f32 %v3462_v30  ;;  %v4375_v30 = vld [vmem:[%s5978_s3 + $0x620] ss:$28 sps:$4 sm:$0xff]  }
 0x1a2   :  { %v5443_v34 = vpop.f32.mrb[2].mxu1 }
 0x1a3   :  { %v1207_v35 = vpop.f32.mrb[3].mxu1 }
 0x1a4   :  { %v3466_v36 = vadd.f32 %v1207_v35, %v633_v33  ;;  %v4379_v33 = vld [vmem:[%s5978_s3 + $0x65c] ss:$28 sps:$4 sm:$0xff]   ;;  %v3465_v35 = vadd.f32 %v5443_v34, %v629_v29  ;;  %v4447_v29 = vld [vmem:[%s5978_s3 + $0x244] ss:$28 sps:$4 sm:$0xff]  }
 0x1a5   :  { %v5451_v39 = vpop.eup %4525  ;;  %v4388_v34 = vld [vmem:[%s5978_s3 + $0x69c] ss:$28 sps:$4 sm:$0xff]  }
 0x1a6   :  { %4529 = vtanh.f32 %v3466_v36  ;;  %v5459_v42 = vpop.eup %4527  ;;  %2019 = vmatprep.mubr.f32.mxu0 %v5451_v39  ;;  %2161 = vmatprep.mubr.f32.mxu1 %v5451_v39  ;;  %v4381_v36 = vld [vmem:[%s5978_s3 + $0x658] ss:$28 sps:$4 sm:$0xff]  }
 0x1a7   :  { %2020 = vmatmul.mubr.f32.vlgmr.msra.gmra.mrb[2].mxu0 %v5459_v42  ;;  %2162 = vmatmul.mubr.f32.vlgmr.msra.gmra.mrb[4].mxu1 %v5459_v42  ;;  %4531 = vtanh.f32 %v3465_v35  ;;  %v4455_v35 = vld [vmem:[%s5978_s3 + $0x600] ss:$28 sps:$4 sm:$0xff]  }
 0x1a8   :  { %3080 = vmatpush1.bf16.msra.mxu0 %v4303_v37  ;;  %3208 = vmatpush1.bf16.msra.mxu1 %v4306_v38  ;;  %v4384_v37 = vld [vmem:[%s5978_s3 + $0x660] ss:$28 sps:$4 sm:$0xff]   ;;  %v4385_v38 = vld [vmem:[%s5978_s3 + $0x694] ss:$28 sps:$4 sm:$0xff]  }
 0x1a9   :  { %3082 = vmatprep.subr.bf16.mxu0 %v4307_v40  ;;  %3210 = vmatprep.subr.bf16.mxu1 %v4310_v41  ;;  %v4387_v40 = vld [vmem:[%s5978_s3 + $0x690] ss:$28 sps:$4 sm:$0xff]   ;;  %v4390_v41 = vld [vmem:[%s5978_s3 + $0x698] ss:$28 sps:$4 sm:$0xff]  }
 0x1ac   :  { %3084 = vmatpush1.bf16.msra.mxu0 %v4309_v43  ;;  %3212 = vmatpush1.bf16.msra.mxu1 %v4312_v44  ;;  %v4391_v43 = vld [vmem:[%s5978_s3 + $0x6cc] ss:$28 sps:$4 sm:$0xff]   ;;  %v4394_v44 = vld [vmem:[%s5978_s3 + $0x6d4] ss:$28 sps:$4 sm:$0xff]  }
 0x1ad   :  { %3086 = vmatprep.subr.bf16.mxu0 %v4313_v45  ;;  %3214 = vmatprep.subr.bf16.mxu1 %v4316_v46  ;;  %v4393_v45 = vld [vmem:[%s5978_s3 + $0x6c8] ss:$28 sps:$4 sm:$0xff]   ;;  %v4396_v46 = vld [vmem:[%s5978_s3 + $0x6d0] ss:$28 sps:$4 sm:$0xff]  }
 0x1b0   :  { %v5489_v51 = vpop.eup %4529  ;;  %3088 = vmatpush1.bf16.msra.mxu0 %v4315_v47  ;;  %3216 = vmatpush1.bf16.msra.mxu1 %v4318_v48  ;;  %v4397_v47 = vld [vmem:[%s5978_s3 + $0x14] ss:$28 sps:$4 sm:$0xff]  }
 0x1b1   :  { %2090 = vmatprep.mubr.f32.mxu0 %v5489_v51  ;;  %2232 = vmatprep.mubr.f32.mxu1 %v5489_v51  ;;  %v4400_v48 = vld [vmem:[%s5978_s3 + $0x1d8] ss:$28 sps:$4 sm:$0xff]  }
 0x1b2   :  { %3090 = vmatprep.subr.bf16.mxu0 %v4319_v49  ;;  %3218 = vmatprep.subr.bf16.mxu1 %v4322_v50  ;;  %v4399_v49 = vld [vmem:[%s5978_s3 + $0x10] ss:$28 sps:$4 sm:$0xff]   ;;  %v4401_v50 = vld [vmem:[%s5978_s3 + $0x18] ss:$28 sps:$4 sm:$0xff]  }
 0x1b4   :  { %3092 = vmatpush1.bf16.msra.mxu0 %v4321_v52  ;;  %3220 = vmatpush1.bf16.msra.mxu1 %v4324_v53  ;;  %v5660_v52 = vpop.eup %4531  ;;  %v4402_v53 = vld [vmem:[%s5978_s3 + $0x4c] ss:$28 sps:$4 sm:$0xff]  }
 0x1b5   :  { %3094 = vmatprep.subr.bf16.mxu0 %v4325_v54  ;;  %3222 = vmatprep.subr.bf16.mxu1 %v4328_v55  ;;  %v4405_v54 = vld [vmem:[%s5978_s3 + $0x210] ss:$28 sps:$4 sm:$0xff]   ;;  %v4404_v55 = vld [vmem:[%s5978_s3 + $0x48] ss:$28 sps:$4 sm:$0xff]  }
 0x1b8   :  { %3096 = vmatpush1.bf16.msra.mxu0 %v4327_v56  ;;  %3224 = vmatpush1.bf16.msra.mxu1 %v4330_v57  ;;  %v4406_v56 = vld [vmem:[%s5978_s3 + $0x50] ss:$28 sps:$4 sm:$0xff]   ;;  %v4407_v57 = vld [vmem:[%s5978_s3 + $0x84] ss:$28 sps:$4 sm:$0xff]  }
 0x1b9   :  { %3098 = vmatprep.subr.bf16.mxu0 %v4331_v58  ;;  %3226 = vmatprep.subr.bf16.mxu1 %v4334_v59  ;;  %v4410_v58 = vld [vmem:[%s5978_s3 + $0x248] ss:$28 sps:$4 sm:$0xff]   ;;  %v4409_v59 = vld [vmem:[%s5978_s3 + $0x80] ss:$28 sps:$4 sm:$0xff]  }
 0x1bc   :  { %3100 = vmatpush1.bf16.msra.mxu0 %v4333_v60  ;;  %3228 = vmatpush1.bf16.msra.mxu1 %v4336_v61  ;;  %v4412_v60 = vld [vmem:[%s5978_s3 + $0xbc] ss:$28 sps:$4 sm:$0xff]  }
 0x1bd   :  { %3102 = vmatprep.subr.bf16.mxu0 %v4337_v62  ;;  %3230 = vmatprep.subr.bf16.mxu1 %v4340_v63  ;;  %v4415_v61 = vld [vmem:[%s5978_s3 + $0x280] ss:$28 sps:$4 sm:$0xff]   ;;  %v4414_v62 = vld [vmem:[%s5978_s3 + $0xb8] ss:$28 sps:$4 sm:$0xff]  }
 0x1be   :  { %v4416_v63 = vld [vmem:[%s5978_s3 + $0xc0] ss:$28 sps:$4 sm:$0xff]  }
 0x1c0   :  { %3104 = vmatpush1.bf16.msra.mxu0 %v4339_v0  ;;  %3232 = vmatpush1.bf16.msra.mxu1 %v4342_v1  ;;  %v4417_v0 = vld [vmem:[%s5978_s3 + $0xf4] ss:$28 sps:$4 sm:$0xff]  }
 0x1c1   :  { %3106 = vmatprep.subr.bf16.mxu0 %v4343_v3  ;;  %3234 = vmatprep.subr.bf16.mxu1 %v4346_v4  ;;  %v4420_v1 = vld [vmem:[%s5978_s3 + $0x2b8] ss:$28 sps:$4 sm:$0xff]   ;;  %v4419_v3 = vld [vmem:[%s5978_s3 + $0xf0] ss:$28 sps:$4 sm:$0xff]  }
 0x1c2   :  { %v4421_v4 = vld [vmem:[%s5978_s3 + $0xf8] ss:$28 sps:$4 sm:$0xff]  }
 0x1c4   :  { %3108 = vmatpush1.bf16.msra.mxu0 %v4345_v5  ;;  %3236 = vmatpush1.bf16.msra.mxu1 %v4348_v6  ;;  %v4422_v5 = vld [vmem:[%s5978_s3 + $0x12c] ss:$28 sps:$4 sm:$0xff]  }
 0x1c5   :  { %3110 = vmatprep.subr.bf16.mxu0 %v4349_v7  ;;  %3238 = vmatprep.subr.bf16.mxu1 %v4352_v8  ;;  %v4425_v6 = vld [vmem:[%s5978_s3 + $0x2f0] ss:$28 sps:$4 sm:$0xff]   ;;  %v4424_v7 = vld [vmem:[%s5978_s3 + $0x128] ss:$28 sps:$4 sm:$0xff]  }
 0x1c6   :  { %v4426_v8 = vld [vmem:[%s5978_s3 + $0x130] ss:$28 sps:$4 sm:$0xff]  }
 0x1c8   :  { %3112 = vmatpush1.bf16.msra.mxu0 %v4351_v9  ;;  %3240 = vmatpush1.bf16.msra.mxu1 %v4354_v10  ;;  %v4427_v9 = vld [vmem:[%s5978_s3 + $0x164] ss:$28 sps:$4 sm:$0xff]  }
 0x1c9   :  { %3114 = vmatprep.subr.bf16.mxu0 %v4355_v11  ;;  %3242 = vmatprep.subr.bf16.mxu1 %v4358_v12  ;;  %v4430_v10 = vld [vmem:[%s5978_s3 + $0x328] ss:$28 sps:$4 sm:$0xff]   ;;  %v4429_v11 = vld [vmem:[%s5978_s3 + $0x160] ss:$28 sps:$4 sm:$0xff]  }
 0x1ca   :  { %v4431_v12 = vld [vmem:[%s5978_s3 + $0x168] ss:$28 sps:$4 sm:$0xff]  }
 0x1cc   :  { %3116 = vmatpush1.bf16.msra.mxu0 %v4357_v13  ;;  %3244 = vmatpush1.bf16.msra.mxu1 %v4360_v14  ;;  %v4432_v13 = vld [vmem:[%s5978_s3 + $0x19c] ss:$28 sps:$4 sm:$0xff]  }
 0x1cd   :  { %3118 = vmatprep.subr.bf16.mxu0 %v4361_v15  ;;  %3246 = vmatprep.subr.bf16.mxu1 %v4364_v16  ;;  %v4435_v14 = vld [vmem:[%s5978_s3 + $0x360] ss:$28 sps:$4 sm:$0xff]   ;;  %v4434_v15 = vld [vmem:[%s5978_s3 + $0x198] ss:$28 sps:$4 sm:$0xff]  }
 0x1ce   :  { %v4436_v16 = vld [vmem:[%s5978_s3 + $0x1a0] ss:$28 sps:$4 sm:$0xff]  }
 0x1d0   :  { %3120 = vmatpush1.bf16.msra.mxu0 %v4363_v17  ;;  %3248 = vmatpush1.bf16.msra.mxu1 %v4366_v18  ;;  %v4437_v17 = vld [vmem:[%s5978_s3 + $0x1d4] ss:$28 sps:$4 sm:$0xff]  }
 0x1d1   :  { %3122 = vmatprep.subr.bf16.mxu0 %v4367_v19  ;;  %3250 = vmatprep.subr.bf16.mxu1 %v4370_v20  ;;  %v4440_v18 = vld [vmem:[%s5978_s3 + $0x558] ss:$28 sps:$4 sm:$0xff]   ;;  %v4439_v19 = vld [vmem:[%s5978_s3 + $0x1d0] ss:$28 sps:$4 sm:$0xff]  }
 0x1d2   :  { %v4441_v20 = vld [vmem:[%s5978_s3 + $0x398] ss:$28 sps:$4 sm:$0xff]  }
 0x1d4   :  { %3124 = vmatpush1.bf16.msra.mxu0 %v4369_v2  ;;  %3252 = vmatpush1.bf16.msra.mxu1 %v4372_v26  ;;  %v4442_v2 = vld [vmem:[%s5978_s3 + $0x20c] ss:$28 sps:$4 sm:$0xff]  }
 0x1d5   :  { %3126 = vmatprep.subr.bf16.mxu0 %v4373_v27  ;;  %3254 = vmatprep.subr.bf16.mxu1 %v4376_v28  ;;  %v4445_v26 = vld [vmem:[%s5978_s3 + $0x590] ss:$28 sps:$4 sm:$0xff]   ;;  %v4444_v27 = vld [vmem:[%s5978_s3 + $0x208] ss:$28 sps:$4 sm:$0xff]  }
 0x1d6   :  { %v4446_v28 = vld [vmem:[%s5978_s3 + $0x3d0] ss:$28 sps:$4 sm:$0xff]  }
 0x1d8   :  { %3128 = vmatpush1.bf16.msra.mxu0 %v4375_v30  ;;  %3256 = vmatpush1.bf16.msra.mxu1 %v4378_v31  ;;  %v4450_v30 = vld [vmem:[%s5978_s3 + $0x5c8] ss:$28 sps:$4 sm:$0xff]   ;;  %v4449_v31 = vld [vmem:[%s5978_s3 + $0x240] ss:$28 sps:$4 sm:$0xff]  }
 0x1d9   :  { %3130 = vmatprep.subr.bf16.mxu0 %v4379_v33  ;;  %3258 = vmatprep.subr.bf16.mxu1 %v4382_v23  ;;  %v4451_v33 = vld [vmem:[%s5978_s3 + $0x408] ss:$28 sps:$4 sm:$0xff]   ;;  %v4452_v23 = vld [vmem:[%s5978_s3 + $0x27c] ss:$28 sps:$4 sm:$0xff]  }
 0x1dc   :  { %3132 = vmatpush1.bf16.msra.mxu0 %v4381_v36  ;;  %3260 = vmatpush1.bf16.msra.mxu1 %v4384_v37  ;;  %v4454_v36 = vld [vmem:[%s5978_s3 + $0x278] ss:$28 sps:$4 sm:$0xff]   ;;  %v4456_v37 = vld [vmem:[%s5978_s3 + $0x440] ss:$28 sps:$4 sm:$0xff]  }
 0x1dd   :  { %3134 = vmatprep.subr.bf16.mxu0 %v4385_v38  ;;  %3262 = vmatprep.subr.bf16.mxu1 %v4388_v34  ;;  %v4457_v38 = vld [vmem:[%s5978_s3 + $0x2b4] ss:$28 sps:$4 sm:$0xff]  }
 0x1de   :  { %v4460_v34 = vld [vmem:[%s5978_s3 + $0x638] ss:$28 sps:$4 sm:$0xff]  }
 0x1e0   :  { %3136 = vmatpush1.bf16.msra.mxu0 %v4387_v40  ;;  %3264 = vmatpush1.bf16.msra.mxu1 %v4390_v41  ;;  %v4459_v40 = vld [vmem:[%s5978_s3 + $0x2b0] ss:$28 sps:$4 sm:$0xff]   ;;  %v4461_v41 = vld [vmem:[%s5978_s3 + $0x478] ss:$28 sps:$4 sm:$0xff]  }
 0x1e1   :  { %3138 = vmatprep.subr.bf16.mxu0 %v4391_v43  ;;  %3266 = vmatprep.subr.bf16.mxu1 %v4394_v44  ;;  %v4462_v43 = vld [vmem:[%s5978_s3 + $0x2ec] ss:$28 sps:$4 sm:$0xff]  }
 0x1e2   :  { %v4465_v44 = vld [vmem:[%s5978_s3 + $0x670] ss:$28 sps:$4 sm:$0xff]  }
 0x1e4   :  { %3140 = vmatpush1.bf16.msra.mxu0 %v4393_v45  ;;  %3268 = vmatpush1.bf16.msra.mxu1 %v4396_v46  ;;  %v4464_v45 = vld [vmem:[%s5978_s3 + $0x2e8] ss:$28 sps:$4 sm:$0xff]   ;;  %v4466_v46 = vld [vmem:[%s5978_s3 + $0x4b0] ss:$28 sps:$4 sm:$0xff]  }
 0x1e5   :  { %3270 = vmatprep.subr.bf16.mxu0 %v4397_v47  ;;  %3398 = vmatprep.subr.bf16.mxu1 %v4400_v48  ;;  %v4467_v47 = vld [vmem:[%s5978_s3 + $0x324] ss:$28 sps:$4 sm:$0xff]  }
 0x1e6   :  { %v4470_v48 = vld [vmem:[%s5978_s3 + $0x6a8] ss:$28 sps:$4 sm:$0xff]  }
 0x1e7   :  { %2091 = vmatmul.mubr.f32.vlgmr.msra.gmra.mrb[2].mxu0 %v5660_v52  ;;  %2233 = vmatmul.mubr.f32.vlgmr.msra.gmra.mrb[4].mxu1 %v5660_v52 }
 0x1e8   :  { %3272 = vmatpush1.bf16.msra.mxu0 %v4399_v49  ;;  %2303 = vmatprep.mubr.f32.mxu0 %v5451_v39  ;;  %v4469_v49 = vld [vmem:[%s5978_s3 + $0x320] ss:$28 sps:$4 sm:$0xff]  }
 0x1e9   :  { %3400 = vmatpush3.bf16.msra.mxu1 %v4401_v50  ;;  %2445 = vmatprep.mubr.f32.mxu1 %v5451_v39  ;;  %v4411_v39 = vld [vmem:[%s5978_s3 + $0x88] ss:$28 sps:$4 sm:$0xff]  }
 0x1ea   :  { %3274 = vmatprep.subr.bf16.mxu0 %v4402_v53  ;;  %3402 = vmatprep.subr.bf16.mxu1 %v4405_v54  ;;  %v4471_v50 = vld [vmem:[%s5978_s3 + $0x4e8] ss:$28 sps:$4 sm:$0xff]   ;;  %v4472_v53 = vld [vmem:[%s5978_s3 + $0x35c] ss:$28 sps:$4 sm:$0xff]  }
 0x1eb   :  { %v4475_v54 = vld [vmem:[%s5978_s3 + $0x6e0] ss:$28 sps:$4 sm:$0xff]  }
 0x1ec   :  { %3276 = vmatpush1.bf16.msra.mxu0 %v4404_v55  ;;  %v4474_v55 = vld [vmem:[%s5978_s3 + $0x358] ss:$28 sps:$4 sm:$0xff]  }
 0x1ed   :  { %3404 = vmatpush3.bf16.msra.mxu1 %v4406_v56  ;;  %3278 = vmatprep.subr.bf16.mxu0 %v4407_v57  ;;  %v4476_v56 = vld [vmem:[%s5978_s3 + $0x520] ss:$28 sps:$4 sm:$0xff]   ;;  %v4477_v57 = vld [vmem:[%s5978_s3 + $0x394] ss:$28 sps:$4 sm:$0xff]  }
 0x1ee   :  { %3406 = vmatprep.subr.bf16.mxu1 %v4410_v58  ;;  %v4479_v58 = vld [vmem:[%s5978_s3 + $0x390] ss:$28 sps:$4 sm:$0xff]  }
 0x1f0   :  { %3280 = vmatpush1.bf16.msra.mxu0 %v4409_v59  ;;  %v4480_v59 = vld [vmem:[%s5978_s3 + $0x3cc] ss:$28 sps:$4 sm:$0xff]  }
 0x1f1   :  { %3408 = vmatpush3.bf16.msra.mxu1 %v4411_v39  ;;  %3282 = vmatprep.subr.bf16.mxu0 %v4412_v60  ;;  %v4482_v39 = vld [vmem:[%s5978_s3 + $0x3c8] ss:$28 sps:$4 sm:$0xff]  }
 0x1f2   :  { %3410 = vmatprep.subr.bf16.mxu1 %v4415_v61  ;;  %v4483_v60 = vld [vmem:[%s5978_s3 + $0x404] ss:$28 sps:$4 sm:$0xff]  }
 0x1f3   :  { %v4485_v61 = vld [vmem:[%s5978_s3 + $0x400] ss:$28 sps:$4 sm:$0xff]  }
 0x1f4   :  { %3284 = vmatpush1.bf16.msra.mxu0 %v4414_v62  ;;  %v4489_v62 = vld [vmem:[%s5978_s3 + $0x474] ss:$28 sps:$4 sm:$0xff]  }
 0x1f5   :  { %3412 = vmatpush3.bf16.msra.mxu1 %v4416_v63  ;;  %3286 = vmatprep.subr.bf16.mxu0 %v4417_v0  ;;  %v4491_v63 = vld [vmem:[%s5978_s3 + $0x470] ss:$28 sps:$4 sm:$0xff]  }
 0x1f6   :  { %3414 = vmatprep.subr.bf16.mxu1 %v4420_v1  ;;  %v4492_v0 = vld [vmem:[%s5978_s3 + $0x4ac] ss:$28 sps:$4 sm:$0xff]  }
 0x1f7   :  { %v4494_v1 = vld [vmem:[%s5978_s3 + $0x4a8] ss:$28 sps:$4 sm:$0xff]  }
 0x1f8   :  { %3288 = vmatpush1.bf16.msra.mxu0 %v4419_v3  ;;  %v4495_v3 = vld [vmem:[%s5978_s3 + $0x4e4] ss:$28 sps:$4 sm:$0xff]  }
 0x1f9   :  { %3416 = vmatpush3.bf16.msra.mxu1 %v4421_v4  ;;  %3290 = vmatprep.subr.bf16.mxu0 %v4422_v5  ;;  %v4497_v4 = vld [vmem:[%s5978_s3 + $0x4e0] ss:$28 sps:$4 sm:$0xff]  }
 0x1fa   :  { %3418 = vmatprep.subr.bf16.mxu1 %v4425_v6  ;;  %v4498_v5 = vld [vmem:[%s5978_s3 + $0x51c] ss:$28 sps:$4 sm:$0xff]  }
 0x1fb   :  { %v4500_v6 = vld [vmem:[%s5978_s3 + $0x518] ss:$28 sps:$4 sm:$0xff]  }
 0x1fc   :  { %3292 = vmatpush1.bf16.msra.mxu0 %v4424_v7  ;;  %v4501_v7 = vld [vmem:[%s5978_s3 + $0x554] ss:$28 sps:$4 sm:$0xff]  }
 0x1fd   :  { %3420 = vmatpush3.bf16.msra.mxu1 %v4426_v8  ;;  %3294 = vmatprep.subr.bf16.mxu0 %v4427_v9  ;;  %v4503_v8 = vld [vmem:[%s5978_s3 + $0x550] ss:$28 sps:$4 sm:$0xff]  }
 0x1fe   :  { %3422 = vmatprep.subr.bf16.mxu1 %v4430_v10  ;;  %v4504_v9 = vld [vmem:[%s5978_s3 + $0x58c] ss:$28 sps:$4 sm:$0xff]  }
 0x1ff   :  { %v4506_v10 = vld [vmem:[%s5978_s3 + $0x588] ss:$28 sps:$4 sm:$0xff]  }
 0x200   :  { %3296 = vmatpush1.bf16.msra.mxu0 %v4429_v11  ;;  %v4507_v11 = vld [vmem:[%s5978_s3 + $0x5c4] ss:$28 sps:$4 sm:$0xff]  }
 0x201   :  { %3424 = vmatpush3.bf16.msra.mxu1 %v4431_v12  ;;  %3298 = vmatprep.subr.bf16.mxu0 %v4432_v13  ;;  %v4509_v12 = vld [vmem:[%s5978_s3 + $0x5c0] ss:$28 sps:$4 sm:$0xff]  }
 0x202   :  { %3426 = vmatprep.subr.bf16.mxu1 %v4435_v14  ;;  %v4510_v13 = vld [vmem:[%s5978_s3 + $0x5fc] ss:$28 sps:$4 sm:$0xff]  }
 0x203   :  { %v4512_v14 = vld [vmem:[%s5978_s3 + $0x5f8] ss:$28 sps:$4 sm:$0xff]  }
 0x204   :  { %3300 = vmatpush1.bf16.msra.mxu0 %v4434_v15  ;;  %v4513_v15 = vld [vmem:[%s5978_s3 + $0x634] ss:$28 sps:$4 sm:$0xff]  }
 0x205   :  { %3428 = vmatpush3.bf16.msra.mxu1 %v4436_v16  ;;  %3302 = vmatprep.subr.bf16.mxu0 %v4437_v17  ;;  %v4515_v16 = vld [vmem:[%s5978_s3 + $0x630] ss:$28 sps:$4 sm:$0xff]  }
 0x206   :  { %3430 = vmatprep.subr.bf16.mxu1 %v4440_v18  ;;  %v4516_v17 = vld [vmem:[%s5978_s3 + $0x66c] ss:$28 sps:$4 sm:$0xff]  }
 0x207   :  { %v4518_v18 = vld [vmem:[%s5978_s3 + $0x668] ss:$28 sps:$4 sm:$0xff]  }
 0x208   :  { %2446 = vmatmul.mubr.f32.vlgmr.msra.gmra.mrb[6].mxu1 %v5459_v42  ;;  %3304 = vmatpush1.bf16.msra.mxu0 %v4439_v19  ;;  %v4519_v19 = vld [vmem:[%s5978_s3 + $0x6a4] ss:$28 sps:$4 sm:$0xff]  }
 0x209   :  { %3432 = vmatpush3.bf16.msra.mxu1 %v4441_v20  ;;  %2515 = vmatprep.mubr.f32.mxu1 %v5489_v51  ;;  %v4521_v20 = vld [vmem:[%s5978_s3 + $0x6a0] ss:$28 sps:$4 sm:$0xff]  }
 0x20a   :  { %3306 = vmatprep.subr.bf16.mxu0 %v4442_v2  ;;  %3434 = vmatprep.subr.bf16.mxu1 %v4445_v26  ;;  %v4522_v2 = vld [vmem:[%s5978_s3 + $0x6dc] ss:$28 sps:$4 sm:$0xff]  }
 0x20b   :  { %v4524_v26 = vld [vmem:[%s5978_s3 + $0x6d8] ss:$28 sps:$4 sm:$0xff]  }
 0x20c   :  { %3308 = vmatpush1.bf16.msra.mxu0 %v4444_v27  ;;  %v1918_v27 = vld [vmem:[%s5979_s4] sm:$0x7f] }
 0x20d   :  { %3436 = vmatpush3.bf16.msra.mxu1 %v4446_v28  ;;  %3310 = vmatprep.subr.bf16.mxu0 %v4447_v29  ;;  %v1923_v28 = vrot.slane %v1918_v27, %v620_v22  ;;  %v1931_v29 = vrot.slane %v1918_v27, %v628_v25 }
 0x20e   :  { %3438 = vmatprep.subr.bf16.mxu1 %v4450_v30  ;;  %v1927_v30 = vrot.slane %v1918_v27, %v624_v24 }
 0x210   :  { %3312 = vmatpush1.bf16.msra.mxu0 %v4449_v31  ;;  %v1935_v31 = vrot.slane %v1918_v27, %v632_v32 }
 0x211   :  { %3440 = vmatpush3.bf16.msra.mxu1 %v4451_v33  ;;  %3314 = vmatprep.subr.bf16.mxu0 %v4452_v23 }
 0x212   :  { %3442 = vmatprep.subr.bf16.mxu1 %v4455_v35 }
 0x214   :  { %3316 = vmatpush1.bf16.msra.mxu0 %v4454_v36 }
 0x215   :  { %3444 = vmatpush3.bf16.msra.mxu1 %v4456_v37  ;;  %3318 = vmatprep.subr.bf16.mxu0 %v4457_v38 }
 0x216   :  { %3446 = vmatprep.subr.bf16.mxu1 %v4460_v34 }
 0x218   :  { %3320 = vmatpush1.bf16.msra.mxu0 %v4459_v40 }
 0x219   :  { %3448 = vmatpush3.bf16.msra.mxu1 %v4461_v41  ;;  %3322 = vmatprep.subr.bf16.mxu0 %v4462_v43 }
 0x21a   :  { %3450 = vmatprep.subr.bf16.mxu1 %v4465_v44  ;;  %v1946_v44 = vsub.s32 6, %v5422_v21 }
 0x21c   :  { %3324 = vmatpush1.bf16.msra.mxu0 %v4464_v45  ;;  %v1947_v45 = vrot.slane %v1918_v27, %v1946_v44 }
 0x21d   :  { %3452 = vmatpush3.bf16.msra.mxu1 %v4466_v46  ;;  %3326 = vmatprep.subr.bf16.mxu0 %v4467_v47 }
 0x21e   :  { %3454 = vmatprep.subr.bf16.mxu1 %v4470_v48 }
 0x220   :  { %3328 = vmatpush1.bf16.msra.mxu0 %v4469_v49 }
 0x221   :  { %3456 = vmatpush3.bf16.msra.mxu1 %v4471_v50  ;;  %3330 = vmatprep.subr.bf16.mxu0 %v4472_v53 }
 0x222   :  { %3458 = vmatprep.subr.bf16.mxu1 %v4475_v54  ;;  %v1938_v54 = vsub.s32 4, %v5422_v21 }
 0x224   :  { %3332 = vmatpush1.bf16.msra.mxu0 %v4474_v55  ;;  %v1942_v55 = vsub.s32 5, %v5422_v21 }
 0x225   :  { %3460 = vmatpush3.bf16.msra.mxu1 %v4476_v56  ;;  %3334 = vmatprep.subr.bf16.mxu0 %v4477_v57  ;;  %v1939_v56 = vrot.slane %v1918_v27, %v1938_v54 }
 0x226   :  { %v1943_v57 = vrot.slane %v1918_v27, %v1942_v55 }
 0x227   :  { %2304 = vmatmul.mubr.f32.vlgmr.msra.gmra.mrb[4].mxu0 %v5459_v42  ;;  %v4486_v42 = vld [vmem:[%s5978_s3 + $0x43c] ss:$28 sps:$4 sm:$0xff]  }
 0x228   :  { %2516 = vmatmul.mubr.f32.vlgmr.msra.gmra.mrb[8].mxu1 %v5660_v52  ;;  %3336 = vmatpush1.bf16.msra.mxu0 %v4479_v58 }
 0x229   :  { %2374 = vmatprep.mubr.f32.mxu0 %v5489_v51  ;;  %3338 = vmatprep.subr.bf16.mxu0 %v4480_v59  ;;  %v4488_v51 = vld [vmem:[%s5978_s3 + $0x438] ss:$28 sps:$4 sm:$0xff]   ;;  %s4573_s3 = smov [#allocation2]  }
 0x22a   :  { %s2541_s4 = sshll.u32 %s4573_s3, 4  ;;  %s2542_s4 = int_to_ptr.vmem [resolvable:$true] %s2541_s4 }
 0x22b   :  { %s4548_s9 = scalar_lea.vmem %s2542_s4, 896  ;;  %p4553_p1 = scmp.lt.s32.totalorder %s2542_s4, %s2542_s4 }
 0x22c   :  { %3340 = vmatpush1.bf16.msra.mxu0 %v4482_v39  ;;  %p4549_p0 = scmp.ne.s32.totalorder %s2542_s4, %s4548_s9  ;;  %p4554_p2 = scmp.lt.s32.totalorder %s4548_s9, %s4548_s9 }
 0x22d   :  { %3342 = vmatprep.subr.bf16.mxu0 %v4483_v60 }
 0x22e   :  { %p4555_p3 = por %p4554_p2, %p4553_p1 }
 0x230   :  { %3344 = vmatpush1.bf16.msra.mxu0 %v4485_v61  ;;  %p4556_p4 = pnand %p4555_p3, %p4549_p0 }
 0x231   :  { %3346 = vmatprep.subr.bf16.mxu0 %v4486_v42 }
 0x234   :  { %3348 = vmatpush1.bf16.msra.mxu0 %v4488_v51 }
 0x235   :  { %3350 = vmatprep.subr.bf16.mxu0 %v4489_v62 }
 0x238   :  { %3352 = vmatpush1.bf16.msra.mxu0 %v4491_v63 }
 0x239   :  { %3354 = vmatprep.subr.bf16.mxu0 %v4492_v0 }
 0x23c   :  { %3356 = vmatpush1.bf16.msra.mxu0 %v4494_v1 }
 0x23d   :  { %3358 = vmatprep.subr.bf16.mxu0 %v4495_v3 }
 0x240   :  { %3360 = vmatpush1.bf16.msra.mxu0 %v4497_v4 }
 0x241   :  { %3362 = vmatprep.subr.bf16.mxu0 %v4498_v5 }
 0x244   :  { %3364 = vmatpush1.bf16.msra.mxu0 %v4500_v6 }
 0x245   :  { %3366 = vmatprep.subr.bf16.mxu0 %v4501_v7 }
 0x248   :  { %3368 = vmatpush1.bf16.msra.mxu0 %v4503_v8 }
 0x249   :  { %3370 = vmatprep.subr.bf16.mxu0 %v4504_v9 }
 0x24c   :  { %3372 = vmatpush1.bf16.msra.mxu0 %v4506_v10 }
 0x24d   :  { %3374 = vmatprep.subr.bf16.mxu0 %v4507_v11 }
 0x250   :  { %3376 = vmatpush1.bf16.msra.mxu0 %v4509_v12 }
 0x251   :  { %3378 = vmatprep.subr.bf16.mxu0 %v4510_v13 }
 0x254   :  { %3380 = vmatpush1.bf16.msra.mxu0 %v4512_v14 }
 0x255   :  { %3382 = vmatprep.subr.bf16.mxu0 %v4513_v15 }
 0x258   :  { %3384 = vmatpush1.bf16.msra.mxu0 %v4515_v16 }
 0x259   :  { %3386 = vmatprep.subr.bf16.mxu0 %v4516_v17 }
 0x25c   :  { %3388 = vmatpush1.bf16.msra.mxu0 %v4518_v18 }
 0x25d   :  { %3390 = vmatprep.subr.bf16.mxu0 %v4519_v19 }
 0x260   :  { %3392 = vmatpush1.bf16.msra.mxu0 %v4521_v20 }
 0x261   :  { %3394 = vmatprep.subr.bf16.mxu0 %v4522_v2 }
 0x264   :  { %3396 = vmatpush1.bf16.msra.mxu0 %v4524_v26 }
 0x267   :  { %2375 = vmatmul.mubr.f32.vlgmr.msra.gmra.mrb[4].mxu0 %v5660_v52 }
 0x2ba   :  { %v2092_v33 = vpop.f32.mrb[2].mxu0  ;;  %v2234_v23 = vpop.f32.mrb[4].mxu1 }
 0x2bb   :  { %v3467_v35 = vadd.f32 %v2092_v33, %v1923_v28  ;;  %v3469_v52 = vadd.f32 %v2234_v23, %v1931_v29  ;;  %v2094_v36 = vpop.f32.mrb[3].mxu0  ;;  %v2236_v37 = vpop.f32.mrb[5].mxu1 }
 0x2bc   :  { %v3468_v38 = vadd.f32 %v2094_v36, %v1927_v30  ;;  %v3470_v34 = vadd.f32 %v2236_v37, %v1935_v31 }
 0x2bd   :  { %4533 = vtanh.f32 %v3467_v35 }
 0x2be   :  { %4535 = vtanh.f32 %v3469_v52 }
 0x2bf   :  { %4537 = vtanh.f32 %v3468_v38 }
 0x2c0   :  { %4539 = vtanh.f32 %v3470_v34 }
 0x2c7   :  { %v4534_v22 = vpop.eup %4533 }
 0x2c8   :  { %v4536_v25 = vpop.eup %4535  ;;  %2528 = vst [vmem:[#allocation2] sm:$0xff] %v4534_v22 }
 0x2c9   :  { %v4538_v40 = vpop.eup %4537  ;;  %2530 = vst [vmem:[#allocation2 + $0x10] sm:$0xff] %v4536_v25 }
 0x2ca   :  { %v4540_v24 = vpop.eup %4539  ;;  %2529 = vst [vmem:[#allocation2 + $0x8] sm:$0xff] %v4538_v40 }
 0x2cb   :  { %2531 = vst [vmem:[#allocation2 + $0x18] sm:$0xff] %v4540_v24 }
 0x2db   :  { %v2583_v32 = vpop.f32.mrb[6].mxu1 }
 0x2dc   :  { %v2584_v41 = vpop.f32.mrb[7].mxu1 }
 0x2dd   :  { %v2585_v43 = vadd.f32 %v2584_v41, %v2583_v32 }
 0x2df   :  { %v2448_v48 = vadd.f32 %v2585_v43, %v1947_v45 }
 0x2fb   :  { %v2618_v46 = vpop.f32.mrb[8].mxu1 }
 0x2fc   :  { %v2619_v47 = vpop.f32.mrb[9].mxu1 }
 0x2fd   :  { %v2620_v49 = vadd.f32 %v2619_v47, %v2618_v46 }
 0x2ff   :  { %v2518_v50 = vadd.f32 %v2620_v49, %v2448_v48 }
 0x301   :  { %4541 = vtanh.f32 %v2518_v50 }
 0x30b   :  { %v4542_v53 = vpop.eup %4541 }
 0x30c   :  { %2534 = vst.msk [vmem:[#allocation2 + $0x30] sm:$0xff] %vm638_vm0, %v4542_v53 }
 0x33a   :  { %v2376_v58 = vpop.f32.mrb[4].mxu0 }
 0x33b   :  { %v3471_v59 = vadd.f32 %v2376_v58, %v1939_v56  ;;  %v2378_v39 = vpop.f32.mrb[5].mxu0 }
 0x33c   :  { %v3472_v60 = vadd.f32 %v2378_v39, %v1943_v57 }
 0x33d   :  { %4543 = vtanh.f32 %v3471_v59 }
 0x33e   :  { %4545 = vtanh.f32 %v3472_v60 }
 0x347   :  { %v4544_v61 = vpop.eup %4543 }
 0x348   :  { %v4546_v42 = vpop.eup %4545  ;;  %2532 = vst [vmem:[#allocation2 + $0x20] sm:$0xff] %v4544_v61 }
 0x349   :  { %2533 = vst [vmem:[#allocation2 + $0x28] sm:$0xff] %v4546_v42 }
 0x34a   :  { %4559 = shalt.err (!%p4556_p4)
}
 0x34b   :  { %s4560_s1 = scalar_lea.hbm %s5980_s5, 896 }
 0x34c   :  { %p4561_p5 = scmp.ne.s32.totalorder %s5980_s5, %s4560_s1  ;;  %p4564_p6 = scmp.lt.u32.totalorder %s4560_s1, %s5980_s5 }
 0x34e   :  { %p4566_p7 = pnand %p4564_p6, %p4561_p5 }
 0x350   :  { %4569 = shalt.err (!%p4566_p7)
}
 0x351   :  { %2544 = dma.vmem_to_hbm [thread:$0]  %s2542_s4, 896, %s5980_s5, [#allocation3]  }
 0x352   :  { %4570 = dma.done.wait [#allocation3], 896  }
 0x353   :  { %4571 = vsyncadd [#allocation3], 4294966400 }
 0x354   :  { %2548 = vsyncpa [#allocation3], 1 }

</bundles_post_ra>
